<compile_context>
chip_gen: v7x
topology: tpu7x:2x2x1
jax: 0.10.0
libtpu: 0.0.40
codegen_flags: <defaults>
</compile_context>

<pallas_src>
import functools

import jax
import jax.numpy as jnp
from jax.experimental import pallas as pl
from jax.experimental.pallas import tpu as pltpu

# ---------------- model config (small synthetic BERT) ----------------
VOCAB_SIZE = 30 + 1      # config['vocab_size'] + 1
HIDDEN     = 32          # encoder hidden size
NUM_LAYERS = 2
NUM_HEADS  = 2
HEAD_DIM   = HIDDEN // NUM_HEADS
INTERMED   = 64
MAX_LEN    = 8
CLASS_NUM  = 9
OUT_PAD    = 128         # lane-dense padded classifier width
LN_EPS     = 1e-12


# ---------------- in-kernel helpers ----------------
def _layernorm(h, g, b):
    mean = jnp.mean(h, axis=-1, keepdims=True)
    var = jnp.mean((h - mean) ** 2, axis=-1, keepdims=True)
    return (h - mean) * jax.lax.rsqrt(var + LN_EPS) * g + b


def _gelu(x):
    # tanh-approx GELU (jax.nn.gelu default)
    return 0.5 * x * (1.0 + jnp.tanh(0.7978845608028654 * (x + 0.044715 * x * x * x)))


# ---------------- single fused Pallas kernel ----------------
def fused_forward_kernel(emb_ref,
                         emb_ln_g_ref, emb_ln_b_ref,
                         qkv_w_ref, qkv_b_ref,
                         ao_w_ref, ao_b_ref,
                         ln1_g_ref, ln1_b_ref,
                         ff1_w_ref, ff1_b_ref,
                         ff2_w_ref, ff2_b_ref,
                         ln2_g_ref, ln2_b_ref,
                         cls_w_ref, cls_b_ref,
                         out_ref,
                         *, batch, seq):
    B, S = batch, seq
    D, H, Dh = HIDDEN, NUM_HEADS, HEAD_DIM
    scale = 1.0 / (Dh ** 0.5)

    # Embedding LayerNorm (no fake zero residual).
    h = _layernorm(emb_ref[...], emb_ln_g_ref[...], emb_ln_b_ref[...])

    # Transformer layers, fully unrolled, everything stays in VMEM / vregs.
    for l in range(NUM_LAYERS):
        qkv = (jnp.dot(h, qkv_w_ref[l], preferred_element_type=jnp.float32)
               + qkv_b_ref[l])                                    # (B*S, 3D)
        q = qkv[:, 0 * D:1 * D]
        k = qkv[:, 1 * D:2 * D]
        v = qkv[:, 2 * D:3 * D]

        # Self-attention: static per-(batch, head) 2-D slices, no transposes
        # of 4-D tensors and no extra kernel launches.
        ctx_rows = []
        for b in range(B):
            rs = slice(b * S, (b + 1) * S)
            head_ctx = []
            for hh in range(H):
                cs = slice(hh * Dh, (hh + 1) * Dh)
                qbh = q[rs, cs]                                   # (S, Dh)
                kbh = k[rs, cs]
                vbh = v[rs, cs]
                s = jax.lax.dot_general(
                    qbh, kbh, (((1,), (1,)), ((), ())),
                    preferred_element_type=jnp.float32) * scale   # (S, S)
                s = s - jnp.max(s, axis=-1, keepdims=True)
                p = jnp.exp(s)
                p = p * pl.reciprocal(jnp.sum(p, axis=-1, keepdims=True),
                                      approx=False)
                head_ctx.append(
                    jnp.dot(p, vbh, preferred_element_type=jnp.float32))
            ctx_rows.append(jnp.concatenate(head_ctx, axis=-1))   # (S, D)
        ctx = jnp.concatenate(ctx_rows, axis=0)                   # (B*S, D)

        attn_out = (jnp.dot(ctx, ao_w_ref[l],
                            preferred_element_type=jnp.float32) + ao_b_ref[l])
        h1 = _layernorm(attn_out + h, ln1_g_ref[l], ln1_b_ref[l])

        ff = (jnp.dot(h1, ff1_w_ref[l],
                      preferred_element_type=jnp.float32) + ff1_b_ref[l])
        ff = _gelu(ff)
        ff = (jnp.dot(ff, ff2_w_ref[l],
                      preferred_element_type=jnp.float32) + ff2_b_ref[l])
        h = _layernorm(ff + h1, ln2_g_ref[l], ln2_b_ref[l])

    # Classifier into a lane-dense padded (B*S, 128) output slab.
    logits = (jnp.dot(h, cls_w_ref[...],
                      preferred_element_type=jnp.float32) + cls_b_ref[...])
    out_ref[...] = logits.astype(out_ref.dtype)


# ---------------- model forward (one pallas_call) ----------------
def torch_model_forward(x_ids, params):
    """Equivalent to TorchModel.forward(x) with target=None, use_crf=False."""
    B, S = x_ids.shape
    D = HIDDEN

    # Embedding gather/sum is a single tiny XLA op (no clean Pallas win here).
    emb = (jnp.take(params["word_emb"], x_ids, axis=0)
           + params["pos_emb"][None, :S, :]
           + params["type_emb"][0][None, None, :])
    emb = emb.reshape(B * S, D).astype(jnp.float32)

    kernel = functools.partial(fused_forward_kernel, batch=B, seq=S)
    logits_pad = pl.pallas_call(
        kernel,
        out_shape=jax.ShapeDtypeStruct((B * S, OUT_PAD), jnp.float32),
    )(emb,
      params["emb_ln_g"], params["emb_ln_b"],
      params["qkv_w"], params["qkv_b"],
      params["ao_w"], params["ao_b"],
      params["ln1_g"], params["ln1_b"],
      params["ff1_w"], params["ff1_b"],
      params["ff2_w"], params["ff2_b"],
      params["ln2_g"], params["ln2_b"],
      params["cls_w_pad"], params["cls_b_pad"])

    return logits_pad[:, :CLASS_NUM].reshape(B, S, CLASS_NUM)


# ---------------- deterministic parameter init ----------------
def init_params(key):
    def nrm(k, shape, scale=0.02):
        return scale * jax.random.normal(k, shape, dtype=jnp.float32)

    keys = iter(jax.random.split(key, 4 + NUM_LAYERS * 4))

    params = {
        "word_emb": nrm(next(keys), (VOCAB_SIZE, HIDDEN)),
        "pos_emb":  nrm(next(keys), (MAX_LEN, HIDDEN)),
        "type_emb": nrm(next(keys), (2, HIDDEN)),
        "emb_ln_g": jnp.ones((1, HIDDEN), jnp.float32),
        "emb_ln_b": jnp.zeros((1, HIDDEN), jnp.float32),
    }

    cls_w = nrm(next(keys), (HIDDEN, CLASS_NUM))
    params["cls_w_pad"] = (jnp.zeros((HIDDEN, OUT_PAD), jnp.float32)
                           .at[:, :CLASS_NUM].set(cls_w))
    params["cls_b_pad"] = jnp.zeros((1, OUT_PAD), jnp.float32)

    qkv_w, ao_w, ff1_w, ff2_w = [], [], [], []
    for _ in range(NUM_LAYERS):
        qkv_w.append(nrm(next(keys), (HIDDEN, 3 * HIDDEN)))
        ao_w.append(nrm(next(keys), (HIDDEN, HIDDEN)))
        ff1_w.append(nrm(next(keys), (HIDDEN, INTERMED)))
        ff2_w.append(nrm(next(keys), (INTERMED, HIDDEN)))

    params.update({
        "qkv_w": jnp.stack(qkv_w),
        "qkv_b": jnp.zeros((NUM_LAYERS, 1, 3 * HIDDEN), jnp.float32),
        "ao_w":  jnp.stack(ao_w),
        "ao_b":  jnp.zeros((NUM_LAYERS, 1, HIDDEN), jnp.float32),
        "ln1_g": jnp.ones((NUM_LAYERS, 1, HIDDEN), jnp.float32),
        "ln1_b": jnp.zeros((NUM_LAYERS, 1, HIDDEN), jnp.float32),
        "ff1_w": jnp.stack(ff1_w),
        "ff1_b": jnp.zeros((NUM_LAYERS, 1, INTERMED), jnp.float32),
        "ff2_w": jnp.stack(ff2_w),
        "ff2_b": jnp.zeros((NUM_LAYERS, 1, HIDDEN), jnp.float32),
        "ln2_g": jnp.ones((NUM_LAYERS, 1, HIDDEN), jnp.float32),
        "ln2_b": jnp.zeros((NUM_LAYERS, 1, HIDDEN), jnp.float32),
    })
    return params


if __name__ == "__main__":
    key = jax.random.PRNGKey(0)
    k_param, k_inp = jax.random.split(key)
    params = init_params(k_param)

    B, S = 2, MAX_LEN
    x_ids = jax.random.randint(k_inp, (B, S), minval=1, maxval=VOCAB_SIZE,
                               dtype=jnp.int32)

    forward = jax.jit(torch_model_forward)
    logits = forward(x_ids, params)
    jax.block_until_ready(logits)
    assert logits.shape == (B, S, CLASS_NUM)
    assert bool(jnp.all(jnp.isfinite(logits)))
    print("KERNEL_OK")
</pallas_src>

<mosaic_0001>
module attributes {stable_mosaic.version = 11 : i64} {
  func.func @fused_forward_kernel(%arg0: memref<16x32xf32, #tpu.memory_space<vmem>>, %arg1: memref<1x32xf32, #tpu.memory_space<vmem>>, %arg2: memref<1x32xf32, #tpu.memory_space<vmem>>, %arg3: memref<2x32x96xf32, #tpu.memory_space<vmem>>, %arg4: memref<2x1x96xf32, #tpu.memory_space<vmem>>, %arg5: memref<2x32x32xf32, #tpu.memory_space<vmem>>, %arg6: memref<2x1x32xf32, #tpu.memory_space<vmem>>, %arg7: memref<2x1x32xf32, #tpu.memory_space<vmem>>, %arg8: memref<2x1x32xf32, #tpu.memory_space<vmem>>, %arg9: memref<2x32x64xf32, #tpu.memory_space<vmem>>, %arg10: memref<2x1x64xf32, #tpu.memory_space<vmem>>, %arg11: memref<2x64x32xf32, #tpu.memory_space<vmem>>, %arg12: memref<2x1x32xf32, #tpu.memory_space<vmem>>, %arg13: memref<2x1x32xf32, #tpu.memory_space<vmem>>, %arg14: memref<2x1x32xf32, #tpu.memory_space<vmem>>, %arg15: memref<32x128xf32, #tpu.memory_space<vmem>>, %arg16: memref<1x128xf32, #tpu.memory_space<vmem>>, %arg17: memref<16x128xf32, #tpu.memory_space<vmem>>) attributes {dimension_semantics = [], scalar_prefetch = 0 : i64, scratch_operands = 0 : i64, tpu.core_type = #tpu.core_type<tc>} {
    %c0 = arith.constant 0 : index
    %c0_0 = arith.constant 0 : index
    %0 = vector.load %arg0[%c0, %c0_0] : memref<16x32xf32, #tpu.memory_space<vmem>>, vector<16x32xf32>
    %c0_1 = arith.constant 0 : index
    %c0_2 = arith.constant 0 : index
    %1 = vector.load %arg1[%c0_1, %c0_2] : memref<1x32xf32, #tpu.memory_space<vmem>>, vector<1x32xf32>
    %c0_3 = arith.constant 0 : index
    %c0_4 = arith.constant 0 : index
    %2 = vector.load %arg2[%c0_3, %c0_4] : memref<1x32xf32, #tpu.memory_space<vmem>>, vector<1x32xf32>
    %cst = arith.constant dense<0.000000e+00> : vector<16xf32>
    %3 = vector.multi_reduction <add>, %0, %cst [1] : vector<16x32xf32> to vector<16xf32>
    %4 = vector.shape_cast %3 : vector<16xf32> to vector<16x1xf32>
    %cst_5 = arith.constant 3.200000e+01 : f32
    %5 = vector.broadcast %cst_5 : f32 to vector<16x1xf32>
    %6 = arith.divf %4, %5 : vector<16x1xf32>
    %7 = vector.broadcast %6 : vector<16x1xf32> to vector<16x32xf32>
    %8 = arith.subf %0, %7 : vector<16x32xf32>
    %9 = arith.mulf %8, %8 : vector<16x32xf32>
    %cst_6 = arith.constant dense<0.000000e+00> : vector<16xf32>
    %10 = vector.multi_reduction <add>, %9, %cst_6 [1] : vector<16x32xf32> to vector<16xf32>
    %11 = vector.shape_cast %10 : vector<16xf32> to vector<16x1xf32>
    %cst_7 = arith.constant 3.200000e+01 : f32
    %12 = vector.broadcast %cst_7 : f32 to vector<16x1xf32>
    %13 = arith.divf %11, %12 : vector<16x1xf32>
    %14 = vector.broadcast %6 : vector<16x1xf32> to vector<16x32xf32>
    %15 = arith.subf %0, %14 : vector<16x32xf32>
    %cst_8 = arith.constant 9.99999996E-13 : f32
    %16 = vector.broadcast %cst_8 : f32 to vector<16x1xf32>
    %17 = arith.addf %13, %16 : vector<16x1xf32>
    %18 = math.rsqrt %17 : vector<16x1xf32>
    %19 = vector.broadcast %18 : vector<16x1xf32> to vector<16x32xf32>
    %20 = arith.mulf %15, %19 : vector<16x32xf32>
    %21 = vector.broadcast %1 : vector<1x32xf32> to vector<16x32xf32>
    %22 = arith.mulf %20, %21 : vector<16x32xf32>
    %23 = vector.broadcast %2 : vector<1x32xf32> to vector<16x32xf32>
    %24 = arith.addf %22, %23 : vector<16x32xf32>
    %c0_9 = arith.constant 0 : index
    %c0_10 = arith.constant 0 : index
    %c0_11 = arith.constant 0 : index
    %25 = vector.load %arg3[%c0_9, %c0_10, %c0_11] : memref<2x32x96xf32, #tpu.memory_space<vmem>>, vector<1x32x96xf32>
    %26 = vector.shape_cast %25 : vector<1x32x96xf32> to vector<32x96xf32>
    %cst_12 = arith.constant dense<0.000000e+00> : vector<16x96xf32>
    %27 = tpu.matmul %24, %26, %cst_12 {dimension_numbers = #tpu.dot_dimension_numbers<[1], [0], [0], [1], [0, 0, 1, 1], [], []>} : vector<16x32xf32>, vector<32x96xf32>, vector<16x96xf32> -> vector<16x96xf32>
    %c0_13 = arith.constant 0 : index
    %c0_14 = arith.constant 0 : index
    %c0_15 = arith.constant 0 : index
    %28 = vector.load %arg4[%c0_13, %c0_14, %c0_15] : memref<2x1x96xf32, #tpu.memory_space<vmem>>, vector<1x1x96xf32>
    %29 = vector.shape_cast %28 : vector<1x1x96xf32> to vector<1x96xf32>
    %30 = vector.broadcast %29 : vector<1x96xf32> to vector<16x96xf32>
    %31 = arith.addf %27, %30 : vector<16x96xf32>
    %32 = vector.extract_strided_slice %31 {offsets = [0, 0], sizes = [16, 32], strides = [1, 1]} : vector<16x96xf32> to vector<16x32xf32>
    %33 = vector.extract_strided_slice %31 {offsets = [0, 32], sizes = [16, 32], strides = [1, 1]} : vector<16x96xf32> to vector<16x32xf32>
    %34 = vector.extract_strided_slice %31 {offsets = [0, 64], sizes = [16, 32], strides = [1, 1]} : vector<16x96xf32> to vector<16x32xf32>
    %35 = vector.extract_strided_slice %32 {offsets = [0, 0], sizes = [8, 16], strides = [1, 1]} : vector<16x32xf32> to vector<8x16xf32>
    %36 = vector.extract_strided_slice %33 {offsets = [0, 0], sizes = [8, 16], strides = [1, 1]} : vector<16x32xf32> to vector<8x16xf32>
    %37 = vector.extract_strided_slice %34 {offsets = [0, 0], sizes = [8, 16], strides = [1, 1]} : vector<16x32xf32> to vector<8x16xf32>
    %cst_16 = arith.constant dense<0.000000e+00> : vector<8x8xf32>
    %38 = tpu.matmul %35, %36, %cst_16 {dimension_numbers = #tpu.dot_dimension_numbers<[1], [1], [0], [0], [0, 0, 1, 0], [], []>} : vector<8x16xf32>, vector<8x16xf32>, vector<8x8xf32> -> vector<8x8xf32>
    %cst_17 = arith.constant 2.500000e-01 : f32
    %39 = vector.broadcast %cst_17 : f32 to vector<8x8xf32>
    %40 = arith.mulf %38, %39 : vector<8x8xf32>
    %cst_18 = arith.constant dense<0xFF800000> : vector<8xf32>
    %41 = vector.multi_reduction <maximumf>, %40, %cst_18 [1] : vector<8x8xf32> to vector<8xf32>
    %42 = vector.shape_cast %41 : vector<8xf32> to vector<8x1xf32>
    %43 = vector.broadcast %42 : vector<8x1xf32> to vector<8x8xf32>
    %44 = arith.subf %40, %43 : vector<8x8xf32>
    %45 = math.exp %44 : vector<8x8xf32>
    %cst_19 = arith.constant dense<0.000000e+00> : vector<8xf32>
    %46 = vector.multi_reduction <add>, %45, %cst_19 [1] : vector<8x8xf32> to vector<8xf32>
    %47 = vector.shape_cast %46 : vector<8xf32> to vector<8x1xf32>
    %48 = tpu.reciprocal %47 : vector<8x1xf32> -> vector<8x1xf32>
    %49 = vector.broadcast %48 : vector<8x1xf32> to vector<8x8xf32>
    %50 = arith.mulf %45, %49 : vector<8x8xf32>
    %cst_20 = arith.constant dense<0.000000e+00> : vector<8x16xf32>
    %51 = tpu.matmul %50, %37, %cst_20 {dimension_numbers = #tpu.dot_dimension_numbers<[1], [0], [0], [1], [0, 0, 1, 1], [], []>} : vector<8x8xf32>, vector<8x16xf32>, vector<8x16xf32> -> vector<8x16xf32>
    %52 = vector.extract_strided_slice %32 {offsets = [0, 16], sizes = [8, 16], strides = [1, 1]} : vector<16x32xf32> to vector<8x16xf32>
    %53 = vector.extract_strided_slice %33 {offsets = [0, 16], sizes = [8, 16], strides = [1, 1]} : vector<16x32xf32> to vector<8x16xf32>
    %54 = vector.extract_strided_slice %34 {offsets = [0, 16], sizes = [8, 16], strides = [1, 1]} : vector<16x32xf32> to vector<8x16xf32>
    %cst_21 = arith.constant dense<0.000000e+00> : vector<8x8xf32>
    %55 = tpu.matmul %52, %53, %cst_21 {dimension_numbers = #tpu.dot_dimension_numbers<[1], [1], [0], [0], [0, 0, 1, 0], [], []>} : vector<8x16xf32>, vector<8x16xf32>, vector<8x8xf32> -> vector<8x8xf32>
    %cst_22 = arith.constant 2.500000e-01 : f32
    %56 = vector.broadcast %cst_22 : f32 to vector<8x8xf32>
    %57 = arith.mulf %55, %56 : vector<8x8xf32>
    %cst_23 = arith.constant dense<0xFF800000> : vector<8xf32>
    %58 = vector.multi_reduction <maximumf>, %57, %cst_23 [1] : vector<8x8xf32> to vector<8xf32>
    %59 = vector.shape_cast %58 : vector<8xf32> to vector<8x1xf32>
    %60 = vector.broadcast %59 : vector<8x1xf32> to vector<8x8xf32>
    %61 = arith.subf %57, %60 : vector<8x8xf32>
    %62 = math.exp %61 : vector<8x8xf32>
    %cst_24 = arith.constant dense<0.000000e+00> : vector<8xf32>
    %63 = vector.multi_reduction <add>, %62, %cst_24 [1] : vector<8x8xf32> to vector<8xf32>
    %64 = vector.shape_cast %63 : vector<8xf32> to vector<8x1xf32>
    %65 = tpu.reciprocal %64 : vector<8x1xf32> -> vector<8x1xf32>
    %66 = vector.broadcast %65 : vector<8x1xf32> to vector<8x8xf32>
    %67 = arith.mulf %62, %66 : vector<8x8xf32>
    %cst_25 = arith.constant dense<0.000000e+00> : vector<8x16xf32>
    %68 = tpu.matmul %67, %54, %cst_25 {dimension_numbers = #tpu.dot_dimension_numbers<[1], [0], [0], [1], [0, 0, 1, 1], [], []>} : vector<8x8xf32>, vector<8x16xf32>, vector<8x16xf32> -> vector<8x16xf32>
    %69 = tpu.concatenate %51, %68 in 1 : vector<8x16xf32>, vector<8x16xf32> -> vector<8x32xf32>
    %70 = vector.extract_strided_slice %32 {offsets = [8, 0], sizes = [8, 16], strides = [1, 1]} : vector<16x32xf32> to vector<8x16xf32>
    %71 = vector.extract_strided_slice %33 {offsets = [8, 0], sizes = [8, 16], strides = [1, 1]} : vector<16x32xf32> to vector<8x16xf32>
    %72 = vector.extract_strided_slice %34 {offsets = [8, 0], sizes = [8, 16], strides = [1, 1]} : vector<16x32xf32> to vector<8x16xf32>
    %cst_26 = arith.constant dense<0.000000e+00> : vector<8x8xf32>
    %73 = tpu.matmul %70, %71, %cst_26 {dimension_numbers = #tpu.dot_dimension_numbers<[1], [1], [0], [0], [0, 0, 1, 0], [], []>} : vector<8x16xf32>, vector<8x16xf32>, vector<8x8xf32> -> vector<8x8xf32>
    %cst_27 = arith.constant 2.500000e-01 : f32
    %74 = vector.broadcast %cst_27 : f32 to vector<8x8xf32>
    %75 = arith.mulf %73, %74 : vector<8x8xf32>
    %cst_28 = arith.constant dense<0xFF800000> : vector<8xf32>
    %76 = vector.multi_reduction <maximumf>, %75, %cst_28 [1] : vector<8x8xf32> to vector<8xf32>
    %77 = vector.shape_cast %76 : vector<8xf32> to vector<8x1xf32>
    %78 = vector.broadcast %77 : vector<8x1xf32> to vector<8x8xf32>
    %79 = arith.subf %75, %78 : vector<8x8xf32>
    %80 = math.exp %79 : vector<8x8xf32>
    %cst_29 = arith.constant dense<0.000000e+00> : vector<8xf32>
    %81 = vector.multi_reduction <add>, %80, %cst_29 [1] : vector<8x8xf32> to vector<8xf32>
    %82 = vector.shape_cast %81 : vector<8xf32> to vector<8x1xf32>
    %83 = tpu.reciprocal %82 : vector<8x1xf32> -> vector<8x1xf32>
    %84 = vector.broadcast %83 : vector<8x1xf32> to vector<8x8xf32>
    %85 = arith.mulf %80, %84 : vector<8x8xf32>
    %cst_30 = arith.constant dense<0.000000e+00> : vector<8x16xf32>
    %86 = tpu.matmul %85, %72, %cst_30 {dimension_numbers = #tpu.dot_dimension_numbers<[1], [0], [0], [1], [0, 0, 1, 1], [], []>} : vector<8x8xf32>, vector<8x16xf32>, vector<8x16xf32> -> vector<8x16xf32>
    %87 = vector.extract_strided_slice %32 {offsets = [8, 16], sizes = [8, 16], strides = [1, 1]} : vector<16x32xf32> to vector<8x16xf32>
    %88 = vector.extract_strided_slice %33 {offsets = [8, 16], sizes = [8, 16], strides = [1, 1]} : vector<16x32xf32> to vector<8x16xf32>
    %89 = vector.extract_strided_slice %34 {offsets = [8, 16], sizes = [8, 16], strides = [1, 1]} : vector<16x32xf32> to vector<8x16xf32>
    %cst_31 = arith.constant dense<0.000000e+00> : vector<8x8xf32>
    %90 = tpu.matmul %87, %88, %cst_31 {dimension_numbers = #tpu.dot_dimension_numbers<[1], [1], [0], [0], [0, 0, 1, 0], [], []>} : vector<8x16xf32>, vector<8x16xf32>, vector<8x8xf32> -> vector<8x8xf32>
    %cst_32 = arith.constant 2.500000e-01 : f32
    %91 = vector.broadcast %cst_32 : f32 to vector<8x8xf32>
    %92 = arith.mulf %90, %91 : vector<8x8xf32>
    %cst_33 = arith.constant dense<0xFF800000> : vector<8xf32>
    %93 = vector.multi_reduction <maximumf>, %92, %cst_33 [1] : vector<8x8xf32> to vector<8xf32>
    %94 = vector.shape_cast %93 : vector<8xf32> to vector<8x1xf32>
    %95 = vector.broadcast %94 : vector<8x1xf32> to vector<8x8xf32>
    %96 = arith.subf %92, %95 : vector<8x8xf32>
    %97 = math.exp %96 : vector<8x8xf32>
    %cst_34 = arith.constant dense<0.000000e+00> : vector<8xf32>
    %98 = vector.multi_reduction <add>, %97, %cst_34 [1] : vector<8x8xf32> to vector<8xf32>
    %99 = vector.shape_cast %98 : vector<8xf32> to vector<8x1xf32>
    %100 = tpu.reciprocal %99 : vector<8x1xf32> -> vector<8x1xf32>
    %101 = vector.broadcast %100 : vector<8x1xf32> to vector<8x8xf32>
    %102 = arith.mulf %97, %101 : vector<8x8xf32>
    %cst_35 = arith.constant dense<0.000000e+00> : vector<8x16xf32>
    %103 = tpu.matmul %102, %89, %cst_35 {dimension_numbers = #tpu.dot_dimension_numbers<[1], [0], [0], [1], [0, 0, 1, 1], [], []>} : vector<8x8xf32>, vector<8x16xf32>, vector<8x16xf32> -> vector<8x16xf32>
    %104 = tpu.concatenate %86, %103 in 1 : vector<8x16xf32>, vector<8x16xf32> -> vector<8x32xf32>
    %105 = tpu.concatenate %69, %104 in 0 : vector<8x32xf32>, vector<8x32xf32> -> vector<16x32xf32>
    %c0_36 = arith.constant 0 : index
    %c0_37 = arith.constant 0 : index
    %c0_38 = arith.constant 0 : index
    %106 = vector.load %arg5[%c0_36, %c0_37, %c0_38] : memref<2x32x32xf32, #tpu.memory_space<vmem>>, vector<1x32x32xf32>
    %107 = vector.shape_cast %106 : vector<1x32x32xf32> to vector<32x32xf32>
    %cst_39 = arith.constant dense<0.000000e+00> : vector<16x32xf32>
    %108 = tpu.matmul %105, %107, %cst_39 {dimension_numbers = #tpu.dot_dimension_numbers<[1], [0], [0], [1], [0, 0, 1, 1], [], []>} : vector<16x32xf32>, vector<32x32xf32>, vector<16x32xf32> -> vector<16x32xf32>
    %c0_40 = arith.constant 0 : index
    %c0_41 = arith.constant 0 : index
    %c0_42 = arith.constant 0 : index
    %109 = vector.load %arg6[%c0_40, %c0_41, %c0_42] : memref<2x1x32xf32, #tpu.memory_space<vmem>>, vector<1x1x32xf32>
    %110 = vector.shape_cast %109 : vector<1x1x32xf32> to vector<1x32xf32>
    %111 = vector.broadcast %110 : vector<1x32xf32> to vector<16x32xf32>
    %112 = arith.addf %108, %111 : vector<16x32xf32>
    %113 = arith.addf %112, %24 : vector<16x32xf32>
    %c0_43 = arith.constant 0 : index
    %c0_44 = arith.constant 0 : index
    %c0_45 = arith.constant 0 : index
    %114 = vector.load %arg7[%c0_43, %c0_44, %c0_45] : memref<2x1x32xf32, #tpu.memory_space<vmem>>, vector<1x1x32xf32>
    %115 = vector.shape_cast %114 : vector<1x1x32xf32> to vector<1x32xf32>
    %c0_46 = arith.constant 0 : index
    %c0_47 = arith.constant 0 : index
    %c0_48 = arith.constant 0 : index
    %116 = vector.load %arg8[%c0_46, %c0_47, %c0_48] : memref<2x1x32xf32, #tpu.memory_space<vmem>>, vector<1x1x32xf32>
    %117 = vector.shape_cast %116 : vector<1x1x32xf32> to vector<1x32xf32>
    %cst_49 = arith.constant dense<0.000000e+00> : vector<16xf32>
    %118 = vector.multi_reduction <add>, %113, %cst_49 [1] : vector<16x32xf32> to vector<16xf32>
    %119 = vector.shape_cast %118 : vector<16xf32> to vector<16x1xf32>
    %cst_50 = arith.constant 3.200000e+01 : f32
    %120 = vector.broadcast %cst_50 : f32 to vector<16x1xf32>
    %121 = arith.divf %119, %120 : vector<16x1xf32>
    %122 = vector.broadcast %121 : vector<16x1xf32> to vector<16x32xf32>
    %123 = arith.subf %113, %122 : vector<16x32xf32>
    %124 = arith.mulf %123, %123 : vector<16x32xf32>
    %cst_51 = arith.constant dense<0.000000e+00> : vector<16xf32>
    %125 = vector.multi_reduction <add>, %124, %cst_51 [1] : vector<16x32xf32> to vector<16xf32>
    %126 = vector.shape_cast %125 : vector<16xf32> to vector<16x1xf32>
    %cst_52 = arith.constant 3.200000e+01 : f32
    %127 = vector.broadcast %cst_52 : f32 to vector<16x1xf32>
    %128 = arith.divf %126, %127 : vector<16x1xf32>
    %129 = vector.broadcast %121 : vector<16x1xf32> to vector<16x32xf32>
    %130 = arith.subf %113, %129 : vector<16x32xf32>
    %cst_53 = arith.constant 9.99999996E-13 : f32
    %131 = vector.broadcast %cst_53 : f32 to vector<16x1xf32>
    %132 = arith.addf %128, %131 : vector<16x1xf32>
    %133 = math.rsqrt %132 : vector<16x1xf32>
    %134 = vector.broadcast %133 : vector<16x1xf32> to vector<16x32xf32>
    %135 = arith.mulf %130, %134 : vector<16x32xf32>
    %136 = vector.broadcast %115 : vector<1x32xf32> to vector<16x32xf32>
    %137 = arith.mulf %135, %136 : vector<16x32xf32>
    %138 = vector.broadcast %117 : vector<1x32xf32> to vector<16x32xf32>
    %139 = arith.addf %137, %138 : vector<16x32xf32>
    %c0_54 = arith.constant 0 : index
    %c0_55 = arith.constant 0 : index
    %c0_56 = arith.constant 0 : index
    %140 = vector.load %arg9[%c0_54, %c0_55, %c0_56] : memref<2x32x64xf32, #tpu.memory_space<vmem>>, vector<1x32x64xf32>
    %141 = vector.shape_cast %140 : vector<1x32x64xf32> to vector<32x64xf32>
    %cst_57 = arith.constant dense<0.000000e+00> : vector<16x64xf32>
    %142 = tpu.matmul %139, %141, %cst_57 {dimension_numbers = #tpu.dot_dimension_numbers<[1], [0], [0], [1], [0, 0, 1, 1], [], []>} : vector<16x32xf32>, vector<32x64xf32>, vector<16x64xf32> -> vector<16x64xf32>
    %c0_58 = arith.constant 0 : index
    %c0_59 = arith.constant 0 : index
    %c0_60 = arith.constant 0 : index
    %143 = vector.load %arg10[%c0_58, %c0_59, %c0_60] : memref<2x1x64xf32, #tpu.memory_space<vmem>>, vector<1x1x64xf32>
    %144 = vector.shape_cast %143 : vector<1x1x64xf32> to vector<1x64xf32>
    %145 = vector.broadcast %144 : vector<1x64xf32> to vector<16x64xf32>
    %146 = arith.addf %142, %145 : vector<16x64xf32>
    %cst_61 = arith.constant 5.000000e-01 : f32
    %147 = vector.broadcast %cst_61 : f32 to vector<16x64xf32>
    %148 = arith.mulf %147, %146 : vector<16x64xf32>
    %cst_62 = arith.constant 4.471500e-02 : f32
    %149 = vector.broadcast %cst_62 : f32 to vector<16x64xf32>
    %150 = arith.mulf %149, %146 : vector<16x64xf32>
    %151 = arith.mulf %150, %146 : vector<16x64xf32>
    %152 = arith.mulf %151, %146 : vector<16x64xf32>
    %153 = arith.addf %146, %152 : vector<16x64xf32>
    %cst_63 = arith.constant 0.797884583 : f32
    %154 = vector.broadcast %cst_63 : f32 to vector<16x64xf32>
    %155 = arith.mulf %154, %153 : vector<16x64xf32>
    %156 = math.tanh %155 : vector<16x64xf32>
    %cst_64 = arith.constant 1.000000e+00 : f32
    %157 = vector.broadcast %cst_64 : f32 to vector<16x64xf32>
    %158 = arith.addf %157, %156 : vector<16x64xf32>
    %159 = arith.mulf %148, %158 : vector<16x64xf32>
    %c0_65 = arith.constant 0 : index
    %c0_66 = arith.constant 0 : index
    %c0_67 = arith.constant 0 : index
    %160 = vector.load %arg11[%c0_65, %c0_66, %c0_67] : memref<2x64x32xf32, #tpu.memory_space<vmem>>, vector<1x64x32xf32>
    %161 = vector.shape_cast %160 : vector<1x64x32xf32> to vector<64x32xf32>
    %cst_68 = arith.constant dense<0.000000e+00> : vector<16x32xf32>
    %162 = tpu.matmul %159, %161, %cst_68 {dimension_numbers = #tpu.dot_dimension_numbers<[1], [0], [0], [1], [0, 0, 1, 1], [], []>} : vector<16x64xf32>, vector<64x32xf32>, vector<16x32xf32> -> vector<16x32xf32>
    %c0_69 = arith.constant 0 : index
    %c0_70 = arith.constant 0 : index
    %c0_71 = arith.constant 0 : index
    %163 = vector.load %arg12[%c0_69, %c0_70, %c0_71] : memref<2x1x32xf32, #tpu.memory_space<vmem>>, vector<1x1x32xf32>
    %164 = vector.shape_cast %163 : vector<1x1x32xf32> to vector<1x32xf32>
    %165 = vector.broadcast %164 : vector<1x32xf32> to vector<16x32xf32>
    %166 = arith.addf %162, %165 : vector<16x32xf32>
    %167 = arith.addf %166, %139 : vector<16x32xf32>
    %c0_72 = arith.constant 0 : index
    %c0_73 = arith.constant 0 : index
    %c0_74 = arith.constant 0 : index
    %168 = vector.load %arg13[%c0_72, %c0_73, %c0_74] : memref<2x1x32xf32, #tpu.memory_space<vmem>>, vector<1x1x32xf32>
    %169 = vector.shape_cast %168 : vector<1x1x32xf32> to vector<1x32xf32>
    %c0_75 = arith.constant 0 : index
    %c0_76 = arith.constant 0 : index
    %c0_77 = arith.constant 0 : index
    %170 = vector.load %arg14[%c0_75, %c0_76, %c0_77] : memref<2x1x32xf32, #tpu.memory_space<vmem>>, vector<1x1x32xf32>
    %171 = vector.shape_cast %170 : vector<1x1x32xf32> to vector<1x32xf32>
    %cst_78 = arith.constant dense<0.000000e+00> : vector<16xf32>
    %172 = vector.multi_reduction <add>, %167, %cst_78 [1] : vector<16x32xf32> to vector<16xf32>
    %173 = vector.shape_cast %172 : vector<16xf32> to vector<16x1xf32>
    %cst_79 = arith.constant 3.200000e+01 : f32
    %174 = vector.broadcast %cst_79 : f32 to vector<16x1xf32>
    %175 = arith.divf %173, %174 : vector<16x1xf32>
    %176 = vector.broadcast %175 : vector<16x1xf32> to vector<16x32xf32>
    %177 = arith.subf %167, %176 : vector<16x32xf32>
    %178 = arith.mulf %177, %177 : vector<16x32xf32>
    %cst_80 = arith.constant dense<0.000000e+00> : vector<16xf32>
    %179 = vector.multi_reduction <add>, %178, %cst_80 [1] : vector<16x32xf32> to vector<16xf32>
    %180 = vector.shape_cast %179 : vector<16xf32> to vector<16x1xf32>
    %cst_81 = arith.constant 3.200000e+01 : f32
    %181 = vector.broadcast %cst_81 : f32 to vector<16x1xf32>
    %182 = arith.divf %180, %181 : vector<16x1xf32>
    %183 = vector.broadcast %175 : vector<16x1xf32> to vector<16x32xf32>
    %184 = arith.subf %167, %183 : vector<16x32xf32>
    %cst_82 = arith.constant 9.99999996E-13 : f32
    %185 = vector.broadcast %cst_82 : f32 to vector<16x1xf32>
    %186 = arith.addf %182, %185 : vector<16x1xf32>
    %187 = math.rsqrt %186 : vector<16x1xf32>
    %188 = vector.broadcast %187 : vector<16x1xf32> to vector<16x32xf32>
    %189 = arith.mulf %184, %188 : vector<16x32xf32>
    %190 = vector.broadcast %169 : vector<1x32xf32> to vector<16x32xf32>
    %191 = arith.mulf %189, %190 : vector<16x32xf32>
    %192 = vector.broadcast %171 : vector<1x32xf32> to vector<16x32xf32>
    %193 = arith.addf %191, %192 : vector<16x32xf32>
    %c1 = arith.constant 1 : index
    %c0_83 = arith.constant 0 : index
    %c0_84 = arith.constant 0 : index
    %194 = vector.load %arg3[%c1, %c0_83, %c0_84] : memref<2x32x96xf32, #tpu.memory_space<vmem>>, vector<1x32x96xf32>
    %195 = vector.shape_cast %194 : vector<1x32x96xf32> to vector<32x96xf32>
    %cst_85 = arith.constant dense<0.000000e+00> : vector<16x96xf32>
    %196 = tpu.matmul %193, %195, %cst_85 {dimension_numbers = #tpu.dot_dimension_numbers<[1], [0], [0], [1], [0, 0, 1, 1], [], []>} : vector<16x32xf32>, vector<32x96xf32>, vector<16x96xf32> -> vector<16x96xf32>
    %c1_86 = arith.constant 1 : index
    %c0_87 = arith.constant 0 : index
    %c0_88 = arith.constant 0 : index
    %197 = vector.load %arg4[%c1_86, %c0_87, %c0_88] : memref<2x1x96xf32, #tpu.memory_space<vmem>>, vector<1x1x96xf32>
    %198 = vector.shape_cast %197 : vector<1x1x96xf32> to vector<1x96xf32>
    %199 = vector.broadcast %198 : vector<1x96xf32> to vector<16x96xf32>
    %200 = arith.addf %196, %199 : vector<16x96xf32>
    %201 = vector.extract_strided_slice %200 {offsets = [0, 0], sizes = [16, 32], strides = [1, 1]} : vector<16x96xf32> to vector<16x32xf32>
    %202 = vector.extract_strided_slice %200 {offsets = [0, 32], sizes = [16, 32], strides = [1, 1]} : vector<16x96xf32> to vector<16x32xf32>
    %203 = vector.extract_strided_slice %200 {offsets = [0, 64], sizes = [16, 32], strides = [1, 1]} : vector<16x96xf32> to vector<16x32xf32>
    %204 = vector.extract_strided_slice %201 {offsets = [0, 0], sizes = [8, 16], strides = [1, 1]} : vector<16x32xf32> to vector<8x16xf32>
    %205 = vector.extract_strided_slice %202 {offsets = [0, 0], sizes = [8, 16], strides = [1, 1]} : vector<16x32xf32> to vector<8x16xf32>
    %206 = vector.extract_strided_slice %203 {offsets = [0, 0], sizes = [8, 16], strides = [1, 1]} : vector<16x32xf32> to vector<8x16xf32>
    %cst_89 = arith.constant dense<0.000000e+00> : vector<8x8xf32>
    %207 = tpu.matmul %204, %205, %cst_89 {dimension_numbers = #tpu.dot_dimension_numbers<[1], [1], [0], [0], [0, 0, 1, 0], [], []>} : vector<8x16xf32>, vector<8x16xf32>, vector<8x8xf32> -> vector<8x8xf32>
    %cst_90 = arith.constant 2.500000e-01 : f32
    %208 = vector.broadcast %cst_90 : f32 to vector<8x8xf32>
    %209 = arith.mulf %207, %208 : vector<8x8xf32>
    %cst_91 = arith.constant dense<0xFF800000> : vector<8xf32>
    %210 = vector.multi_reduction <maximumf>, %209, %cst_91 [1] : vector<8x8xf32> to vector<8xf32>
    %211 = vector.shape_cast %210 : vector<8xf32> to vector<8x1xf32>
    %212 = vector.broadcast %211 : vector<8x1xf32> to vector<8x8xf32>
    %213 = arith.subf %209, %212 : vector<8x8xf32>
    %214 = math.exp %213 : vector<8x8xf32>
    %cst_92 = arith.constant dense<0.000000e+00> : vector<8xf32>
    %215 = vector.multi_reduction <add>, %214, %cst_92 [1] : vector<8x8xf32> to vector<8xf32>
    %216 = vector.shape_cast %215 : vector<8xf32> to vector<8x1xf32>
    %217 = tpu.reciprocal %216 : vector<8x1xf32> -> vector<8x1xf32>
    %218 = vector.broadcast %217 : vector<8x1xf32> to vector<8x8xf32>
    %219 = arith.mulf %214, %218 : vector<8x8xf32>
    %cst_93 = arith.constant dense<0.000000e+00> : vector<8x16xf32>
    %220 = tpu.matmul %219, %206, %cst_93 {dimension_numbers = #tpu.dot_dimension_numbers<[1], [0], [0], [1], [0, 0, 1, 1], [], []>} : vector<8x8xf32>, vector<8x16xf32>, vector<8x16xf32> -> vector<8x16xf32>
    %221 = vector.extract_strided_slice %201 {offsets = [0, 16], sizes = [8, 16], strides = [1, 1]} : vector<16x32xf32> to vector<8x16xf32>
    %222 = vector.extract_strided_slice %202 {offsets = [0, 16], sizes = [8, 16], strides = [1, 1]} : vector<16x32xf32> to vector<8x16xf32>
    %223 = vector.extract_strided_slice %203 {offsets = [0, 16], sizes = [8, 16], strides = [1, 1]} : vector<16x32xf32> to vector<8x16xf32>
    %cst_94 = arith.constant dense<0.000000e+00> : vector<8x8xf32>
    %224 = tpu.matmul %221, %222, %cst_94 {dimension_numbers = #tpu.dot_dimension_numbers<[1], [1], [0], [0], [0, 0, 1, 0], [], []>} : vector<8x16xf32>, vector<8x16xf32>, vector<8x8xf32> -> vector<8x8xf32>
    %cst_95 = arith.constant 2.500000e-01 : f32
    %225 = vector.broadcast %cst_95 : f32 to vector<8x8xf32>
    %226 = arith.mulf %224, %225 : vector<8x8xf32>
    %cst_96 = arith.constant dense<0xFF800000> : vector<8xf32>
    %227 = vector.multi_reduction <maximumf>, %226, %cst_96 [1] : vector<8x8xf32> to vector<8xf32>
    %228 = vector.shape_cast %227 : vector<8xf32> to vector<8x1xf32>
    %229 = vector.broadcast %228 : vector<8x1xf32> to vector<8x8xf32>
    %230 = arith.subf %226, %229 : vector<8x8xf32>
    %231 = math.exp %230 : vector<8x8xf32>
    %cst_97 = arith.constant dense<0.000000e+00> : vector<8xf32>
    %232 = vector.multi_reduction <add>, %231, %cst_97 [1] : vector<8x8xf32> to vector<8xf32>
    %233 = vector.shape_cast %232 : vector<8xf32> to vector<8x1xf32>
    %234 = tpu.reciprocal %233 : vector<8x1xf32> -> vector<8x1xf32>
    %235 = vector.broadcast %234 : vector<8x1xf32> to vector<8x8xf32>
    %236 = arith.mulf %231, %235 : vector<8x8xf32>
    %cst_98 = arith.constant dense<0.000000e+00> : vector<8x16xf32>
    %237 = tpu.matmul %236, %223, %cst_98 {dimension_numbers = #tpu.dot_dimension_numbers<[1], [0], [0], [1], [0, 0, 1, 1], [], []>} : vector<8x8xf32>, vector<8x16xf32>, vector<8x16xf32> -> vector<8x16xf32>
    %238 = tpu.concatenate %220, %237 in 1 : vector<8x16xf32>, vector<8x16xf32> -> vector<8x32xf32>
    %239 = vector.extract_strided_slice %201 {offsets = [8, 0], sizes = [8, 16], strides = [1, 1]} : vector<16x32xf32> to vector<8x16xf32>
    %240 = vector.extract_strided_slice %202 {offsets = [8, 0], sizes = [8, 16], strides = [1, 1]} : vector<16x32xf32> to vector<8x16xf32>
    %241 = vector.extract_strided_slice %203 {offsets = [8, 0], sizes = [8, 16], strides = [1, 1]} : vector<16x32xf32> to vector<8x16xf32>
    %cst_99 = arith.constant dense<0.000000e+00> : vector<8x8xf32>
    %242 = tpu.matmul %239, %240, %cst_99 {dimension_numbers = #tpu.dot_dimension_numbers<[1], [1], [0], [0], [0, 0, 1, 0], [], []>} : vector<8x16xf32>, vector<8x16xf32>, vector<8x8xf32> -> vector<8x8xf32>
    %cst_100 = arith.constant 2.500000e-01 : f32
    %243 = vector.broadcast %cst_100 : f32 to vector<8x8xf32>
    %244 = arith.mulf %242, %243 : vector<8x8xf32>
    %cst_101 = arith.constant dense<0xFF800000> : vector<8xf32>
    %245 = vector.multi_reduction <maximumf>, %244, %cst_101 [1] : vector<8x8xf32> to vector<8xf32>
    %246 = vector.shape_cast %245 : vector<8xf32> to vector<8x1xf32>
    %247 = vector.broadcast %246 : vector<8x1xf32> to vector<8x8xf32>
    %248 = arith.subf %244, %247 : vector<8x8xf32>
    %249 = math.exp %248 : vector<8x8xf32>
    %cst_102 = arith.constant dense<0.000000e+00> : vector<8xf32>
    %250 = vector.multi_reduction <add>, %249, %cst_102 [1] : vector<8x8xf32> to vector<8xf32>
    %251 = vector.shape_cast %250 : vector<8xf32> to vector<8x1xf32>
    %252 = tpu.reciprocal %251 : vector<8x1xf32> -> vector<8x1xf32>
    %253 = vector.broadcast %252 : vector<8x1xf32> to vector<8x8xf32>
    %254 = arith.mulf %249, %253 : vector<8x8xf32>
    %cst_103 = arith.constant dense<0.000000e+00> : vector<8x16xf32>
    %255 = tpu.matmul %254, %241, %cst_103 {dimension_numbers = #tpu.dot_dimension_numbers<[1], [0], [0], [1], [0, 0, 1, 1], [], []>} : vector<8x8xf32>, vector<8x16xf32>, vector<8x16xf32> -> vector<8x16xf32>
    %256 = vector.extract_strided_slice %201 {offsets = [8, 16], sizes = [8, 16], strides = [1, 1]} : vector<16x32xf32> to vector<8x16xf32>
    %257 = vector.extract_strided_slice %202 {offsets = [8, 16], sizes = [8, 16], strides = [1, 1]} : vector<16x32xf32> to vector<8x16xf32>
    %258 = vector.extract_strided_slice %203 {offsets = [8, 16], sizes = [8, 16], strides = [1, 1]} : vector<16x32xf32> to vector<8x16xf32>
    %cst_104 = arith.constant dense<0.000000e+00> : vector<8x8xf32>
    %259 = tpu.matmul %256, %257, %cst_104 {dimension_numbers = #tpu.dot_dimension_numbers<[1], [1], [0], [0], [0, 0, 1, 0], [], []>} : vector<8x16xf32>, vector<8x16xf32>, vector<8x8xf32> -> vector<8x8xf32>
    %cst_105 = arith.constant 2.500000e-01 : f32
    %260 = vector.broadcast %cst_105 : f32 to vector<8x8xf32>
    %261 = arith.mulf %259, %260 : vector<8x8xf32>
    %cst_106 = arith.constant dense<0xFF800000> : vector<8xf32>
    %262 = vector.multi_reduction <maximumf>, %261, %cst_106 [1] : vector<8x8xf32> to vector<8xf32>
    %263 = vector.shape_cast %262 : vector<8xf32> to vector<8x1xf32>
    %264 = vector.broadcast %263 : vector<8x1xf32> to vector<8x8xf32>
    %265 = arith.subf %261, %264 : vector<8x8xf32>
    %266 = math.exp %265 : vector<8x8xf32>
    %cst_107 = arith.constant dense<0.000000e+00> : vector<8xf32>
    %267 = vector.multi_reduction <add>, %266, %cst_107 [1] : vector<8x8xf32> to vector<8xf32>
    %268 = vector.shape_cast %267 : vector<8xf32> to vector<8x1xf32>
    %269 = tpu.reciprocal %268 : vector<8x1xf32> -> vector<8x1xf32>
    %270 = vector.broadcast %269 : vector<8x1xf32> to vector<8x8xf32>
    %271 = arith.mulf %266, %270 : vector<8x8xf32>
    %cst_108 = arith.constant dense<0.000000e+00> : vector<8x16xf32>
    %272 = tpu.matmul %271, %258, %cst_108 {dimension_numbers = #tpu.dot_dimension_numbers<[1], [0], [0], [1], [0, 0, 1, 1], [], []>} : vector<8x8xf32>, vector<8x16xf32>, vector<8x16xf32> -> vector<8x16xf32>
    %273 = tpu.concatenate %255, %272 in 1 : vector<8x16xf32>, vector<8x16xf32> -> vector<8x32xf32>
    %274 = tpu.concatenate %238, %273 in 0 : vector<8x32xf32>, vector<8x32xf32> -> vector<16x32xf32>
    %c1_109 = arith.constant 1 : index
    %c0_110 = arith.constant 0 : index
    %c0_111 = arith.constant 0 : index
    %275 = vector.load %arg5[%c1_109, %c0_110, %c0_111] : memref<2x32x32xf32, #tpu.memory_space<vmem>>, vector<1x32x32xf32>
    %276 = vector.shape_cast %275 : vector<1x32x32xf32> to vector<32x32xf32>
    %cst_112 = arith.constant dense<0.000000e+00> : vector<16x32xf32>
    %277 = tpu.matmul %274, %276, %cst_112 {dimension_numbers = #tpu.dot_dimension_numbers<[1], [0], [0], [1], [0, 0, 1, 1], [], []>} : vector<16x32xf32>, vector<32x32xf32>, vector<16x32xf32> -> vector<16x32xf32>
    %c1_113 = arith.constant 1 : index
    %c0_114 = arith.constant 0 : index
    %c0_115 = arith.constant 0 : index
    %278 = vector.load %arg6[%c1_113, %c0_114, %c0_115] : memref<2x1x32xf32, #tpu.memory_space<vmem>>, vector<1x1x32xf32>
    %279 = vector.shape_cast %278 : vector<1x1x32xf32> to vector<1x32xf32>
    %280 = vector.broadcast %279 : vector<1x32xf32> to vector<16x32xf32>
    %281 = arith.addf %277, %280 : vector<16x32xf32>
    %282 = arith.addf %281, %193 : vector<16x32xf32>
    %c1_116 = arith.constant 1 : index
    %c0_117 = arith.constant 0 : index
    %c0_118 = arith.constant 0 : index
    %283 = vector.load %arg7[%c1_116, %c0_117, %c0_118] : memref<2x1x32xf32, #tpu.memory_space<vmem>>, vector<1x1x32xf32>
    %284 = vector.shape_cast %283 : vector<1x1x32xf32> to vector<1x32xf32>
    %c1_119 = arith.constant 1 : index
    %c0_120 = arith.constant 0 : index
    %c0_121 = arith.constant 0 : index
    %285 = vector.load %arg8[%c1_119, %c0_120, %c0_121] : memref<2x1x32xf32, #tpu.memory_space<vmem>>, vector<1x1x32xf32>
    %286 = vector.shape_cast %285 : vector<1x1x32xf32> to vector<1x32xf32>
    %cst_122 = arith.constant dense<0.000000e+00> : vector<16xf32>
    %287 = vector.multi_reduction <add>, %282, %cst_122 [1] : vector<16x32xf32> to vector<16xf32>
    %288 = vector.shape_cast %287 : vector<16xf32> to vector<16x1xf32>
    %cst_123 = arith.constant 3.200000e+01 : f32
    %289 = vector.broadcast %cst_123 : f32 to vector<16x1xf32>
    %290 = arith.divf %288, %289 : vector<16x1xf32>
    %291 = vector.broadcast %290 : vector<16x1xf32> to vector<16x32xf32>
    %292 = arith.subf %282, %291 : vector<16x32xf32>
    %293 = arith.mulf %292, %292 : vector<16x32xf32>
    %cst_124 = arith.constant dense<0.000000e+00> : vector<16xf32>
    %294 = vector.multi_reduction <add>, %293, %cst_124 [1] : vector<16x32xf32> to vector<16xf32>
    %295 = vector.shape_cast %294 : vector<16xf32> to vector<16x1xf32>
    %cst_125 = arith.constant 3.200000e+01 : f32
    %296 = vector.broadcast %cst_125 : f32 to vector<16x1xf32>
    %297 = arith.divf %295, %296 : vector<16x1xf32>
    %298 = vector.broadcast %290 : vector<16x1xf32> to vector<16x32xf32>
    %299 = arith.subf %282, %298 : vector<16x32xf32>
    %cst_126 = arith.constant 9.99999996E-13 : f32
    %300 = vector.broadcast %cst_126 : f32 to vector<16x1xf32>
    %301 = arith.addf %297, %300 : vector<16x1xf32>
    %302 = math.rsqrt %301 : vector<16x1xf32>
    %303 = vector.broadcast %302 : vector<16x1xf32> to vector<16x32xf32>
    %304 = arith.mulf %299, %303 : vector<16x32xf32>
    %305 = vector.broadcast %284 : vector<1x32xf32> to vector<16x32xf32>
    %306 = arith.mulf %304, %305 : vector<16x32xf32>
    %307 = vector.broadcast %286 : vector<1x32xf32> to vector<16x32xf32>
    %308 = arith.addf %306, %307 : vector<16x32xf32>
    %c1_127 = arith.constant 1 : index
    %c0_128 = arith.constant 0 : index
    %c0_129 = arith.constant 0 : index
    %309 = vector.load %arg9[%c1_127, %c0_128, %c0_129] : memref<2x32x64xf32, #tpu.memory_space<vmem>>, vector<1x32x64xf32>
    %310 = vector.shape_cast %309 : vector<1x32x64xf32> to vector<32x64xf32>
    %cst_130 = arith.constant dense<0.000000e+00> : vector<16x64xf32>
    %311 = tpu.matmul %308, %310, %cst_130 {dimension_numbers = #tpu.dot_dimension_numbers<[1], [0], [0], [1], [0, 0, 1, 1], [], []>} : vector<16x32xf32>, vector<32x64xf32>, vector<16x64xf32> -> vector<16x64xf32>
    %c1_131 = arith.constant 1 : index
    %c0_132 = arith.constant 0 : index
    %c0_133 = arith.constant 0 : index
    %312 = vector.load %arg10[%c1_131, %c0_132, %c0_133] : memref<2x1x64xf32, #tpu.memory_space<vmem>>, vector<1x1x64xf32>
    %313 = vector.shape_cast %312 : vector<1x1x64xf32> to vector<1x64xf32>
    %314 = vector.broadcast %313 : vector<1x64xf32> to vector<16x64xf32>
    %315 = arith.addf %311, %314 : vector<16x64xf32>
    %cst_134 = arith.constant 5.000000e-01 : f32
    %316 = vector.broadcast %cst_134 : f32 to vector<16x64xf32>
    %317 = arith.mulf %316, %315 : vector<16x64xf32>
    %cst_135 = arith.constant 4.471500e-02 : f32
    %318 = vector.broadcast %cst_135 : f32 to vector<16x64xf32>
    %319 = arith.mulf %318, %315 : vector<16x64xf32>
    %320 = arith.mulf %319, %315 : vector<16x64xf32>
    %321 = arith.mulf %320, %315 : vector<16x64xf32>
    %322 = arith.addf %315, %321 : vector<16x64xf32>
    %cst_136 = arith.constant 0.797884583 : f32
    %323 = vector.broadcast %cst_136 : f32 to vector<16x64xf32>
    %324 = arith.mulf %323, %322 : vector<16x64xf32>
    %325 = math.tanh %324 : vector<16x64xf32>
    %cst_137 = arith.constant 1.000000e+00 : f32
    %326 = vector.broadcast %cst_137 : f32 to vector<16x64xf32>
    %327 = arith.addf %326, %325 : vector<16x64xf32>
    %328 = arith.mulf %317, %327 : vector<16x64xf32>
    %c1_138 = arith.constant 1 : index
    %c0_139 = arith.constant 0 : index
    %c0_140 = arith.constant 0 : index
    %329 = vector.load %arg11[%c1_138, %c0_139, %c0_140] : memref<2x64x32xf32, #tpu.memory_space<vmem>>, vector<1x64x32xf32>
    %330 = vector.shape_cast %329 : vector<1x64x32xf32> to vector<64x32xf32>
    %cst_141 = arith.constant dense<0.000000e+00> : vector<16x32xf32>
    %331 = tpu.matmul %328, %330, %cst_141 {dimension_numbers = #tpu.dot_dimension_numbers<[1], [0], [0], [1], [0, 0, 1, 1], [], []>} : vector<16x64xf32>, vector<64x32xf32>, vector<16x32xf32> -> vector<16x32xf32>
    %c1_142 = arith.constant 1 : index
    %c0_143 = arith.constant 0 : index
    %c0_144 = arith.constant 0 : index
    %332 = vector.load %arg12[%c1_142, %c0_143, %c0_144] : memref<2x1x32xf32, #tpu.memory_space<vmem>>, vector<1x1x32xf32>
    %333 = vector.shape_cast %332 : vector<1x1x32xf32> to vector<1x32xf32>
    %334 = vector.broadcast %333 : vector<1x32xf32> to vector<16x32xf32>
    %335 = arith.addf %331, %334 : vector<16x32xf32>
    %336 = arith.addf %335, %308 : vector<16x32xf32>
    %c1_145 = arith.constant 1 : index
    %c0_146 = arith.constant 0 : index
    %c0_147 = arith.constant 0 : index
    %337 = vector.load %arg13[%c1_145, %c0_146, %c0_147] : memref<2x1x32xf32, #tpu.memory_space<vmem>>, vector<1x1x32xf32>
    %338 = vector.shape_cast %337 : vector<1x1x32xf32> to vector<1x32xf32>
    %c1_148 = arith.constant 1 : index
    %c0_149 = arith.constant 0 : index
    %c0_150 = arith.constant 0 : index
    %339 = vector.load %arg14[%c1_148, %c0_149, %c0_150] : memref<2x1x32xf32, #tpu.memory_space<vmem>>, vector<1x1x32xf32>
    %340 = vector.shape_cast %339 : vector<1x1x32xf32> to vector<1x32xf32>
    %cst_151 = arith.constant dense<0.000000e+00> : vector<16xf32>
    %341 = vector.multi_reduction <add>, %336, %cst_151 [1] : vector<16x32xf32> to vector<16xf32>
    %342 = vector.shape_cast %341 : vector<16xf32> to vector<16x1xf32>
    %cst_152 = arith.constant 3.200000e+01 : f32
    %343 = vector.broadcast %cst_152 : f32 to vector<16x1xf32>
    %344 = arith.divf %342, %343 : vector<16x1xf32>
    %345 = vector.broadcast %344 : vector<16x1xf32> to vector<16x32xf32>
    %346 = arith.subf %336, %345 : vector<16x32xf32>
    %347 = arith.mulf %346, %346 : vector<16x32xf32>
    %cst_153 = arith.constant dense<0.000000e+00> : vector<16xf32>
    %348 = vector.multi_reduction <add>, %347, %cst_153 [1] : vector<16x32xf32> to vector<16xf32>
    %349 = vector.shape_cast %348 : vector<16xf32> to vector<16x1xf32>
    %cst_154 = arith.constant 3.200000e+01 : f32
    %350 = vector.broadcast %cst_154 : f32 to vector<16x1xf32>
    %351 = arith.divf %349, %350 : vector<16x1xf32>
    %352 = vector.broadcast %344 : vector<16x1xf32> to vector<16x32xf32>
    %353 = arith.subf %336, %352 : vector<16x32xf32>
    %cst_155 = arith.constant 9.99999996E-13 : f32
    %354 = vector.broadcast %cst_155 : f32 to vector<16x1xf32>
    %355 = arith.addf %351, %354 : vector<16x1xf32>
    %356 = math.rsqrt %355 : vector<16x1xf32>
    %357 = vector.broadcast %356 : vector<16x1xf32> to vector<16x32xf32>
    %358 = arith.mulf %353, %357 : vector<16x32xf32>
    %359 = vector.broadcast %338 : vector<1x32xf32> to vector<16x32xf32>
    %360 = arith.mulf %358, %359 : vector<16x32xf32>
    %361 = vector.broadcast %340 : vector<1x32xf32> to vector<16x32xf32>
    %362 = arith.addf %360, %361 : vector<16x32xf32>
    %c0_156 = arith.constant 0 : index
    %c0_157 = arith.constant 0 : index
    %363 = vector.load %arg15[%c0_156, %c0_157] : memref<32x128xf32, #tpu.memory_space<vmem>>, vector<32x128xf32>
    %cst_158 = arith.constant dense<0.000000e+00> : vector<16x128xf32>
    %364 = tpu.matmul %362, %363, %cst_158 {dimension_numbers = #tpu.dot_dimension_numbers<[1], [0], [0], [1], [0, 0, 1, 1], [], []>} : vector<16x32xf32>, vector<32x128xf32>, vector<16x128xf32> -> vector<16x128xf32>
    %c0_159 = arith.constant 0 : index
    %c0_160 = arith.constant 0 : index
    %365 = vector.load %arg16[%c0_159, %c0_160] : memref<1x128xf32, #tpu.memory_space<vmem>>, vector<1x128xf32>
    %366 = vector.broadcast %365 : vector<1x128xf32> to vector<16x128xf32>
    %367 = arith.addf %364, %366 : vector<16x128xf32>
    %c0_161 = arith.constant 0 : index
    %c0_162 = arith.constant 0 : index
    %368 = vector.load %arg17[%c0_161, %c0_162] : memref<16x128xf32, #tpu.memory_space<vmem>>, vector<16x128xf32>
    tpu.vector_store %arg17[%c0_161, %c0_162], %367 {strides = array<i32>} : memref<16x128xf32, #tpu.memory_space<vmem>>, vector<16x128xf32>,
    return
  }
}

</mosaic_0001>

<bundles_post_ra>
// kernel: torch_model_forward.1
= control target key start
LH: loop header
LB: loop body
LE: loop exit
PB: predicated region body
PF: predicated region fallthrough
CT: control target
= control target key end

     0   :  { %vm60_vm0 = vcmask 261120   ;;  %v3059_v36 = vmov 0.0   ;;  %vm3060_vm1 = vmmov 0   ;;  %s3061_s27 = smov 96   ;;  %s3062_s28 = smov 80   ;;  %vm199_vm2 = vcmask 130048   ;;  %s3567_s0 = inlined_call_operand.vmem [shape: f32[16,32], index: 0, kind: input, shape index: {}]   ;;  %s3568_s3 = inlined_call_operand.vmem [shape: f32[2,32,96], index: 3, kind: input, shape index: {}]   ;;  %s3569_s1 = inlined_call_operand.vmem [shape: f32[1,32], index: 1, kind: input, shape index: {}]   ;;  %s3570_s2 = inlined_call_operand.vmem [shape: f32[1,32], index: 2, kind: input, shape index: {}]   ;;  %s3571_s4 = inlined_call_operand.vmem [shape: f32[2,1,96], index: 4, kind: input, shape index: {}]   ;;  %s3572_s5 = inlined_call_operand.vmem [shape: f32[2,32,32], index: 5, kind: input, shape index: {}]   ;;  %s3573_s6 = inlined_call_operand.vmem [shape: f32[2,1,32], index: 6, kind: input, shape index: {}]   ;;  %s3574_s9 = inlined_call_operand.vmem [shape: f32[2,32,64], index: 9, kind: input, shape index: {}]   ;;  %s3575_s7 = inlined_call_operand.vmem [shape: f32[2,1,32], index: 7, kind: input, shape index: {}]   ;;  %s3576_s8 = inlined_call_operand.vmem [shape: f32[2,1,32], index: 8, kind: input, shape index: {}]   ;;  %s3577_s11 = inlined_call_operand.vmem [shape: f32[2,64,32], index: 11, kind: input, shape index: {}]   ;;  %s3578_s10 = inlined_call_operand.vmem [shape: f32[2,1,64], index: 10, kind: input, shape index: {}]   ;;  %s3579_s12 = inlined_call_operand.vmem [shape: f32[2,1,32], index: 12, kind: input, shape index: {}]   ;;  %s3580_s13 = inlined_call_operand.vmem [shape: f32[2,1,32], index: 13, kind: input, shape index: {}]   ;;  %s3581_s14 = inlined_call_operand.vmem [shape: f32[2,1,32], index: 14, kind: input, shape index: {}]   ;;  %s3582_s15 = inlined_call_operand.vmem [shape: f32[32,128], index: 15, kind: input, shape index: {}]   ;;  %s3583_s16 = inlined_call_operand.vmem [shape: f32[1,128], index: 16, kind: input, shape index: {}]   ;;  %s3584_s17 = inlined_call_operand.vmem [shape: f32[16,128], index: 17, kind: output, shape index: {}]  }
   0x1   :  { %3587 = sst [smem:[#allocation2_spill]] %s3567_s0  ;;  %v2525_v27 = vld [vmem:[%s3569_s1] ss:$0 sm:$0xff]  ;;  %2719 = vmatprep.subr.mxu1 %v3059_v36  ;;  %2721 = vmatprep.mubr.msk.f32.mxu1 %vm3060_vm1, %v3059_v36  ;;  %s3063_s29 = smov 112   ;;  %vm275_vm3 = vcmask 64512   ;;  %vm1133_vm4 = vcmask 523264  }
   0x2   :  { %3588 = sst [smem:[#allocation3_spill]] %s3568_s3  ;;  %s3589_s26 = sld [smem:[#allocation2_spill]]  ;;  %v2526_v29 = vld [vmem:[%s3570_s2] ss:$0 sm:$0xff] }
   0x3   :  { %s3590_s30 = sld [smem:[#allocation3_spill]]  ;;  %v2527_v37 = vld [vmem:[%s3571_s4] ss:$0 sm:$0xff]  ;;  %s3064_s0 = smov 64  }
   0x4   :  { %s3065_s18 = smov 48  }
   0x8   :  { %v56_v0 = vld [vmem:[%s3589_s26] sm:$0xff]  ;;  %v57_v1 = vld [vmem:[%s3589_s26 + $0x8] sm:$0xff]  ;;  %s3066_s26 = smov 16  }
   0x9   :  { %v61_v2 = vsel %vm60_vm0, %v56_v0, 0.0  ;;  %v64_v3 = vsel %vm60_vm0, %v57_v1, 0.0  ;;  %v104_v14 = vld [vmem:[%s3590_s30] sm:$0xff]  ;;  %v105_v15 = vld [vmem:[%s3590_s30 + $0x8] sm:$0xff]  ;;  %v106_v16 = vld [vmem:[%s3590_s30 + $0x10] sm:$0xff] }
   0xa   :  { %62 = vadd.xlane.f32.xlu0 %v61_v2  ;;  %v2903_v17 = vpack.c.bf16 %v105_v15, %v104_v14  ;;  %v107_v18 = vld [vmem:[%s3590_s30 + $0x18] sm:$0xff] }
   0xb   :  { %v2907_v19 = vpack.c.bf16 %v107_v18, %v106_v16 }
   0xc   :  { %2904 = vmatprep.subr.bf16.mxu0 %v2903_v17 }
   0xd   :  { %2906 = vmatpush3.bf16.msra.mxu0 %v2903_v17 }
   0xe   :  { %65 = vadd.xlane.f32.xlu0 %v64_v3  ;;  %2908 = vmatprep.subr.bf16.mxu0 %v2907_v19 }
  0x11   :  { %2910 = vmatpush3.bf16.msra.mxu0 %v2907_v19 }
  0x12   :  { %2739 = vmatprep.subr.mxu0 %v3059_v36 }
  0x97   :  { %v63_v4 = vpop.xlane.xlu0 %62 }
  0x98   :  { %v68_v5 = vmul.f32 0.03125, %v63_v4 }
  0x9a   :  { %v70_v6 = vsub.f32 %v56_v0, %v68_v5 }
  0x9b   :  { %v66_v7 = vpop.xlane.xlu0 %65 }
  0x9c   :  { %v69_v8 = vmul.f32 0.03125, %v66_v7  ;;  %v72_v9 = vmul.f32 %v70_v6, %v70_v6 }
  0x9e   :  { %v71_v10 = vsub.f32 %v57_v1, %v69_v8  ;;  %v74_v11 = vsel %vm60_vm0, %v72_v9, 0.0 }
  0x9f   :  { %75 = vadd.xlane.f32.xlu1 %v74_v11 }
  0xa0   :  { %v73_v12 = vmul.f32 %v71_v10, %v71_v10 }
  0xa2   :  { %v77_v13 = vsel %vm60_vm0, %v73_v12, 0.0 }
  0xa3   :  { %78 = vadd.xlane.f32.xlu1 %v77_v13 }
 0x12c   :  { %v76_v20 = vpop.xlane.xlu1 %75 }
 0x12d   :  { %v80_v21 = vmul.f32 0.03125, %v76_v20 }
 0x12f   :  { %v82_v22 = vadd.f32 1e-12, %v80_v21 }
 0x130   :  { %v79_v23 = vpop.xlane.xlu1 %78 }
 0x131   :  { %2999 = vrsqrt.f32 %v82_v22  ;;  %v81_v24 = vmul.f32 0.03125, %v79_v23 }
 0x133   :  { %v83_v25 = vadd.f32 1e-12, %v81_v24 }
 0x135   :  { %3001 = vrsqrt.f32 %v83_v25 }
 0x13b   :  { %v3000_v26 = vpop.eup %2999 }
 0x13c   :  { %v86_v28 = vmul.f32 %v3000_v26, %v70_v6 }
 0x13e   :  { %v94_v30 = vmul.f32 %v2525_v27, %v86_v28 }
 0x13f   :  { %v3002_v31 = vpop.eup %3001 }
 0x140   :  { %v87_v32 = vmul.f32 %v3002_v31, %v71_v10  ;;  %v3185_v33 = vadd.f32 %v2526_v29, %v94_v30 }
 0x142   :  { %v95_v34 = vmul.f32 %v2525_v27, %v87_v32  ;;  %2716 = vmatprep.mubr.msk.f32.mxu0 %vm60_vm0, %v3185_v33 }
 0x144   :  { %v3189_v35 = vadd.f32 %v2526_v29, %v95_v34 }
 0x146   :  { %2717 = vmatmul.mubr.msk.f32.vlgmr.msra.gmra.mrb[0].mxu0 %vm60_vm0, %v3189_v35 }
 0x147   :  { %2741 = vmatprep.mubr.msk.f32.mxu0 %vm3060_vm1, %v3059_v36 }
 0x219   :  { %v2718_v38 = vpop.f32.mrb[0].mxu0 }
 0x21a   :  { %v187_v39 = vpop.f32.mrb[1].mxu0  ;;  %v3208_v41 = vadd.f32 %v2718_v38, %v2527_v37 }
 0x21b   :  { %v3202_v40 = vadd.f32 %v2527_v37, %v187_v39 }
 0x21d   :  { %197 = vrot.lane.b32.xlu0 %v3202_v40, %s3061_s27 }
 0x221   :  { %365 = vrot.lane.b32.xlu0 %v3202_v40, %s3062_s28 }
 0x225   :  { %535 = vrot.lane.b32.xlu0 %v3208_v41, %s3061_s27 }
 0x229   :  { %699 = vrot.lane.b32.xlu0 %v3208_v41, %s3063_s29 }
 0x28f   :  { %v198_v42 = vpop.permute.xlu0 %197 }
 0x290   :  { %2720 = vmatpush3.xpose.msk.msra.mxu1 %vm199_vm2, %v198_v42  ;;  %v871_v42 = vld [vmem:[%s3572_s5 + $0x8] sm:$0xff] }
 0x291   :  { %2724 = vmatprep.subr.mxu1 %v3059_v36 }
 0x293   :  { %2722 = vmatmul.mubr.msk.f32.vlgmr.msra.gmra.mrb[0].mxu1 %vm199_vm2, %v3202_v40  ;;  %v366_v43 = vpop.permute.xlu0 %365 }
 0x294   :  { %2726 = vmatprep.mubr.msk.f32.mxu1 %vm3060_vm1, %v3059_v36 }
 0x297   :  { %v536_v44 = vpop.permute.xlu0 %535 }
 0x298   :  { %2740 = vmatpush3.xpose.msk.msra.mxu0 %vm199_vm2, %v536_v44  ;;  %v872_v44 = vld [vmem:[%s3572_s5 + $0x10] sm:$0xff] }
 0x299   :  { %2749 = vmatprep.subr.mxu0 %v3059_v36 }
 0x29b   :  { %2742 = vmatmul.mubr.msk.f32.vlgmr.msra.gmra.mrb[2].mxu0 %vm199_vm2, %v3208_v41  ;;  %v700_v62 = vpop.permute.xlu0 %699 }
 0x29c   :  { %2751 = vmatprep.mubr.msk.f32.mxu0 %vm3060_vm1, %v3059_v36 }
 0x366   :  { %v270_v45 = vpop.f32.mrb[0].mxu1 }
 0x367   :  { %v274_v46 = vmul.f32 0.25, %v270_v45  ;;  %v2723_v47 = vpop.f32.mrb[1].mxu1  ;;  %v873_v45 = vld [vmem:[%s3572_s5 + $0x18] sm:$0xff] }
 0x369   :  { %v276_v48 = vsel %vm275_vm3, %v274_v46, -inf }
 0x36a   :  { %277 = vmax.xlane.f32.xlu1 %v276_v48 }
 0x36e   :  { %v607_v49 = vpop.f32.mrb[2].mxu0 }
 0x36f   :  { %v611_v50 = vmul.f32 0.25, %v607_v49  ;;  %v2743_v51 = vpop.f32.mrb[3].mxu0 }
 0x371   :  { %v612_v52 = vsel %vm275_vm3, %v611_v50, -inf }
 0x372   :  { %613 = vmax.xlane.f32.xlu0 %v612_v52 }
 0x37b   :  { %287 = vrot.lane.b32.xlu1 %v3202_v40, %s3064_s0 }
 0x37f   :  { %363 = vrot.lane.b32.xlu1 %v3202_v40, %s3063_s29 }
 0x3f7   :  { %v278_v53 = vpop.xlane.xlu1 %277 }
 0x3f8   :  { %v279_v54 = vsub.f32 %v274_v46, %v278_v53  ;;  %v2915_v46 = vpack.c.bf16 %v873_v45, %v872_v44  ;;  %v1124_v44 = vld [vmem:[%s3577_s11 + $0x30] sm:$0xff]  ;;  %v1125_v45 = vld [vmem:[%s3577_s11 + $0x38] sm:$0xff] }
 0x3fa   :  { %v280_v55 = vmul.f32 1.442695, %v279_v54 }
 0x3fb   :  { %v288_v56 = vpop.permute.xlu1 %287 }
 0x3fc   :  { %3003 = vpow2.f32 %v280_v55  ;;  %2725 = vmatpush3.msra.mxu1 %v288_v56 }
 0x3fd   :  { %2729 = vmatprep.subr.mxu1 %v3059_v36 }
 0x3ff   :  { %v364_v59 = vpop.permute.xlu1 %363  ;;  %v614_v1 = vpop.xlane.xlu0 %613 }
 0x400   :  { %v615_v2 = vsub.f32 %v611_v50, %v614_v1 }
 0x402   :  { %v616_v3 = vmul.f32 1.442695, %v615_v2 }
 0x406   :  { %v3004_v57 = vpop.eup %3003 }
 0x407   :  { %v282_v58 = vsel %vm275_vm3, %v3004_v57, 0.0 }
 0x408   :  { %283 = vadd.xlane.f32.xlu1 %v282_v58 }
 0x419   :  { %701 = vrot.lane.b32.xlu1 %v3208_v41, %s3062_s28 }
 0x495   :  { %v284_v60 = vpop.xlane.xlu1 %283 }
 0x496   :  { %3005 = vrcp.f32 %v284_v60 }
 0x497   :  { %3007 = vpow2.f32 %v616_v3 }
 0x499   :  { %v702_v61 = vpop.permute.xlu1 %701 }
 0x49a   :  { %2750 = vmatpush3.xpose.msk.msra.mxu0 %vm199_vm2, %v702_v61 }
 0x49d   :  { %2752 = vmatmul.mubr.msk.f32.vlgmr.msra.gmra.mrb[4].mxu0 %vm199_vm2, %v700_v62 }
 0x4a0   :  { %v3006_v63 = vpop.eup %3005 }
 0x4a1   :  { %v286_v0 = vmul.f32 %v3006_v63, %v3004_v57  ;;  %v3008_v14 = vpop.eup %3007  ;;  %v2542_v57 = vld [vmem:[%s3573_s6] ss:$0 sm:$0xff] }
 0x4a2   :  { %v618_v15 = vsel %vm275_vm3, %v3008_v14, 0.0 }
 0x4a3   :  { %2727 = vmatmul.mubr.msk.f32.vlgmr.msra.gmra.mrb[2].mxu1 %vm275_vm3, %v286_v0 }
 0x4a4   :  { %2730 = vmatpush3.xpose.msk.msra.mxu1 %vm199_vm2, %v366_v43  ;;  %2731 = vmatprep.mubr.msk.f32.mxu1 %vm3060_vm1, %v3059_v36 }
 0x4a5   :  { %2734 = vmatprep.subr.mxu1 %v3059_v36 }
 0x4a7   :  { %2732 = vmatmul.mubr.msk.f32.vlgmr.msra.gmra.mrb[4].mxu1 %vm199_vm2, %v364_v59 }
 0x4a8   :  { %2736 = vmatprep.mubr.msk.f32.mxu1 %vm3060_vm1, %v3059_v36 }
 0x570   :  { %v773_v4 = vpop.f32.mrb[4].mxu0 }
 0x571   :  { %v777_v5 = vmul.f32 0.25, %v773_v4  ;;  %v2753_v6 = vpop.f32.mrb[5].mxu0 }
 0x573   :  { %v778_v7 = vsel %vm275_vm3, %v777_v5, -inf }
 0x574   :  { %779 = vmax.xlane.f32.xlu0 %v778_v7 }
 0x576   :  { %v3247_v8 = vpop.f32.mrb[2].mxu1 }
 0x577   :  { %v2728_v9 = vpop.f32.mrb[3].mxu1 }
 0x57a   :  { %v437_v10 = vpop.f32.mrb[4].mxu1 }
 0x57b   :  { %v441_v11 = vmul.f32 0.25, %v437_v10  ;;  %v2733_v12 = vpop.f32.mrb[5].mxu1 }
 0x57d   :  { %v442_v13 = vsel %vm275_vm3, %v441_v11, -inf }
 0x57e   :  { %443 = vmax.xlane.f32.xlu1 %v442_v13  ;;  %v1010_v13 = vld [vmem:[%s3574_s9 + $0x10] sm:$0xff] }
 0x582   :  { %619 = vadd.xlane.f32.xlu1 %v618_v15 }
 0x593   :  { %453 = vrot.lane.b32.xlu1 %v3202_v40, %s3065_s18 }
 0x597   :  { %789 = vrot.lane.b32.xlu1 %v3208_v41, %s3065_s18 }
 0x601   :  { %v780_v16 = vpop.xlane.xlu0 %779 }
 0x602   :  { %v781_v17 = vsub.f32 %v777_v5, %v780_v16 }
 0x604   :  { %v782_v18 = vmul.f32 1.442695, %v781_v17 }
 0x606   :  { %3009 = vpow2.f32 %v782_v18 }
 0x60b   :  { %v444_v19 = vpop.xlane.xlu1 %443 }
 0x60c   :  { %v445_v20 = vsub.f32 %v441_v11, %v444_v19  ;;  %v1009_v11 = vld [vmem:[%s3574_s9 + $0x8] sm:$0xff] }
 0x60e   :  { %v446_v21 = vmul.f32 1.442695, %v445_v20 }
 0x60f   :  { %v620_v22 = vpop.xlane.xlu1 %619 }
 0x610   :  { %v3010_v23 = vpop.eup %3009  ;;  %3011 = vpow2.f32 %v446_v21 }
 0x611   :  { %v784_v24 = vsel %vm275_vm3, %v3010_v23, 0.0 }
 0x612   :  { %785 = vadd.xlane.f32.xlu0 %v784_v24 }
 0x613   :  { %v454_v25 = vpop.permute.xlu1 %453 }
 0x614   :  { %2735 = vmatpush3.msra.mxu1 %v454_v25  ;;  %v2546_v25 = vld [vmem:[%s3576_s8] ss:$0 sm:$0xff] }
 0x615   :  { %2744 = vmatprep.subr.mxu1 %v3059_v36 }
 0x617   :  { %v790_v39 = vpop.permute.xlu1 %789 }
 0x61a   :  { %v3012_v26 = vpop.eup %3011 }
 0x61b   :  { %v448_v27 = vsel %vm275_vm3, %v3012_v26, 0.0 }
 0x61c   :  { %449 = vadd.xlane.f32.xlu0 %v448_v27 }
 0x632   :  { %623 = vrot.lane.b32.xlu0 %v3208_v41, %s3064_s0  ;;  %v870_v41 = vld [vmem:[%s3572_s5] sm:$0xff] }
 0x633   :  { %v2911_v43 = vpack.c.bf16 %v871_v42, %v870_v41  ;;  %v1122_v41 = vld [vmem:[%s3577_s11 + $0x20] sm:$0xff]  ;;  %v1123_v42 = vld [vmem:[%s3577_s11 + $0x28] sm:$0xff] }
 0x635   :  { %2912 = vmatprep.subr.bf16.mxu0 %v2911_v43 }
 0x636   :  { %2914 = vmatpush3.bf16.msra.mxu0 %v2911_v43  ;;  %v2935_v43 = vpack.c.bf16 %v1123_v42, %v1122_v41 }
 0x637   :  { %2916 = vmatprep.subr.bf16.mxu0 %v2915_v46 }
 0x63a   :  { %2918 = vmatpush3.bf16.msra.mxu0 %v2915_v46  ;;  %v2939_v46 = vpack.c.bf16 %v1125_v45, %v1124_v44 }
 0x69f   :  { %v786_v28 = vpop.xlane.xlu0 %785 }
 0x6a9   :  { %v450_v29 = vpop.xlane.xlu0 %449 }
 0x6aa   :  { %3013 = vrcp.f32 %v450_v29 }
 0x6ab   :  { %3015 = vrcp.f32 %v620_v22 }
 0x6ac   :  { %3017 = vrcp.f32 %v786_v28 }
 0x6ad   :  { %v624_v34 = vpop.permute.xlu0 %623 }
 0x6b4   :  { %v3014_v30 = vpop.eup %3013 }
 0x6b5   :  { %v452_v31 = vmul.f32 %v3014_v30, %v3012_v26  ;;  %v3016_v32 = vpop.eup %3015 }
 0x6b6   :  { %v622_v37 = vmul.f32 %v3016_v32, %v3008_v14  ;;  %v3018_v38 = vpop.eup %3017  ;;  %v1011_v14 = vld [vmem:[%s3574_s9 + $0x18] sm:$0xff]  ;;  %v1118_v32 = vld [vmem:[%s3577_s11] sm:$0xff] }
 0x6b7   :  { %2737 = vmatmul.mubr.msk.f32.vlgmr.msra.gmra.mrb[6].mxu1 %vm275_vm3, %v452_v31  ;;  %v788_v40 = vmul.f32 %v3018_v38, %v3010_v23  ;;  %v2923_v15 = vpack.c.bf16 %v1011_v14, %v1010_v13  ;;  %v2545_v23 = vld [vmem:[%s3575_s7] ss:$0 sm:$0xff]  ;;  %v1120_v38 = vld [vmem:[%s3577_s11 + $0x10] sm:$0xff] }
 0x6b8   :  { %2745 = vmatpush3.msra.mxu1 %v624_v34  ;;  %2746 = vmatprep.mubr.msk.f32.mxu1 %vm3060_vm1, %v3059_v36  ;;  %v1119_v34 = vld [vmem:[%s3577_s11 + $0x8] sm:$0xff] }
 0x6b9   :  { %2754 = vmatprep.subr.mxu1 %v3059_v36 }
 0x6bb   :  { %2747 = vmatmul.mubr.msk.f32.vlgmr.msra.gmra.mrb[8].mxu1 %vm275_vm3, %v622_v37  ;;  %v2927_v37 = vpack.c.bf16 %v1119_v34, %v1118_v32 }
 0x6bc   :  { %2755 = vmatpush3.msra.mxu1 %v790_v39  ;;  %2756 = vmatprep.mubr.msk.f32.mxu1 %vm3060_vm1, %v3059_v36  ;;  %v1121_v39 = vld [vmem:[%s3577_s11 + $0x18] sm:$0xff] }
 0x6bd   :  { %2928 = vmatprep.subr.bf16.mxu0 %v2927_v37 }
 0x6bf   :  { %2757 = vmatmul.mubr.msk.f32.vlgmr.msra.gmra.mrb[10].mxu1 %vm275_vm3, %v788_v40  ;;  %v2931_v40 = vpack.c.bf16 %v1121_v39, %v1120_v38  ;;  %v2553_v39 = vld [vmem:[%s3580_s13] ss:$0 sm:$0xff] }
 0x78a   :  { %v525_v47 = vpop.f32.mrb[6].mxu1 }
 0x78b   :  { %530 = vrot.lane.b32.xlu1 %v525_v47, %s3066_s26  ;;  %v2738_v48 = vpop.f32.mrb[7].mxu1  ;;  %v2547_v47 = vld [vmem:[%s3578_s10] ss:$0 sm:$0xff] }
 0x78e   :  { %v695_v49 = vpop.f32.mrb[8].mxu1 }
 0x78f   :  { %v2748_v50 = vpop.f32.mrb[9].mxu1 }
 0x792   :  { %v861_v51 = vpop.f32.mrb[10].mxu1 }
 0x793   :  { %866 = vrot.lane.b32.xlu1 %v861_v51, %s3066_s26  ;;  %v2758_v52 = vpop.f32.mrb[11].mxu1 }
 0x7fd   :  { %v531_v53 = vpop.permute.xlu1 %530 }
 0x7fe   :  { %v533_v54 = vsel %vm199_vm2, %v3247_v8, %v531_v53 }
 0x7ff   :  { %2767 = vmatprep.mubr.msk.f32.mxu0 %vm60_vm0, %v533_v54 }
 0x805   :  { %v867_v55 = vpop.permute.xlu1 %866 }
 0x806   :  { %v869_v56 = vsel %vm199_vm2, %v695_v49, %v867_v55 }
 0x807   :  { %2768 = vmatmul.mubr.msk.f32.vlgmr.msra.gmra.mrb[6].mxu0 %vm60_vm0, %v869_v56 }
 0x808   :  { %2930 = vmatpush3.bf16.msra.mxu0 %v2927_v37 }
 0x809   :  { %2932 = vmatprep.subr.bf16.mxu0 %v2931_v40 }
 0x80c   :  { %2934 = vmatpush3.bf16.msra.mxu0 %v2931_v40 }
 0x80d   :  { %2936 = vmatprep.subr.bf16.mxu0 %v2935_v43 }
 0x810   :  { %2938 = vmatpush3.bf16.msra.mxu0 %v2935_v43  ;;  %v2554_v43 = vld [vmem:[%s3581_s14] ss:$0 sm:$0xff] }
 0x811   :  { %2940 = vmatprep.subr.bf16.mxu0 %v2939_v46 }
 0x814   :  { %2942 = vmatpush3.bf16.msra.mxu0 %v2939_v46 }
 0x815   :  { %2821 = vmatprep.subr.mxu0 %v3059_v36 }
 0x8da   :  { %v2769_v58 = vpop.f32.mrb[6].mxu0 }
 0x8db   :  { %v959_v59 = vadd.f32 %v2769_v58, %v2542_v57  ;;  %v953_v60 = vpop.f32.mrb[7].mxu0 }
 0x8dc   :  { %v954_v61 = vadd.f32 %v2542_v57, %v953_v60 }
 0x8dd   :  { %v963_v62 = vadd.f32 %v959_v59, %v3189_v35 }
 0x8de   :  { %v962_v63 = vadd.f32 %v954_v61, %v3185_v33  ;;  %v1008_v33 = vld [vmem:[%s3574_s9] sm:$0xff] }
 0x8df   :  { %v969_v0 = vsel %vm60_vm0, %v963_v62, 0.0  ;;  %v2919_v12 = vpack.c.bf16 %v1009_v11, %v1008_v33 }
 0x8e0   :  { %970 = vadd.xlane.f32.xlu1 %v969_v0  ;;  %v966_v1 = vsel %vm60_vm0, %v962_v63, 0.0 }
 0x8e1   :  { %967 = vadd.xlane.f32.xlu0 %v966_v1  ;;  %2920 = vmatprep.subr.bf16.mxu1 %v2919_v12 }
 0x8e2   :  { %2922 = vmatpush3.bf16.msra.mxu1 %v2919_v12 }
 0x8e3   :  { %2924 = vmatprep.subr.bf16.mxu1 %v2923_v15 }
 0x8e6   :  { %2926 = vmatpush3.bf16.msra.mxu1 %v2923_v15 }
 0x96d   :  { %v971_v2 = vpop.xlane.xlu1 %970 }
 0x96e   :  { %v973_v3 = vmul.f32 0.03125, %v971_v2  ;;  %v968_v4 = vpop.xlane.xlu0 %967 }
 0x96f   :  { %v972_v5 = vmul.f32 0.03125, %v968_v4 }
 0x970   :  { %v975_v6 = vsub.f32 %v963_v62, %v973_v3 }
 0x971   :  { %v974_v7 = vsub.f32 %v962_v63, %v972_v5 }
 0x972   :  { %v977_v10 = vmul.f32 %v975_v6, %v975_v6 }
 0x973   :  { %v976_v8 = vmul.f32 %v974_v7, %v974_v7 }
 0x974   :  { %v981_v35 = vsel %vm60_vm0, %v977_v10, 0.0 }
 0x975   :  { %v978_v9 = vsel %vm60_vm0, %v976_v8, 0.0 }
 0x976   :  { %979 = vadd.xlane.f32.xlu0 %v978_v9 }
 0x97a   :  { %982 = vadd.xlane.f32.xlu0 %v981_v35 }
 0xa03   :  { %v980_v16 = vpop.xlane.xlu0 %979 }
 0xa04   :  { %v984_v17 = vmul.f32 0.03125, %v980_v16 }
 0xa06   :  { %v986_v18 = vadd.f32 1e-12, %v984_v17 }
 0xa07   :  { %v983_v19 = vpop.xlane.xlu0 %982 }
 0xa08   :  { %3019 = vrsqrt.f32 %v986_v18  ;;  %v985_v20 = vmul.f32 0.03125, %v983_v19 }
 0xa0a   :  { %v987_v21 = vadd.f32 1e-12, %v985_v20 }
 0xa0c   :  { %3021 = vrsqrt.f32 %v987_v21 }
 0xa12   :  { %v3020_v22 = vpop.eup %3019 }
 0xa13   :  { %v990_v24 = vmul.f32 %v3020_v22, %v974_v7 }
 0xa15   :  { %v998_v26 = vmul.f32 %v2545_v23, %v990_v24  ;;  %v2556_v24 = vld [vmem:[%s3590_s30 + $0x28] sm:$0xff] }
 0xa16   :  { %v3022_v27 = vpop.eup %3021 }
 0xa17   :  { %v991_v28 = vmul.f32 %v3022_v27, %v975_v6  ;;  %v3314_v29 = vadd.f32 %v2546_v25, %v998_v26  ;;  %v2550_v6 = vld [vmem:[%s3579_s12] ss:$0 sm:$0xff]  ;;  %v2557_v26 = vld [vmem:[%s3590_s30 + $0x30] sm:$0xff]  ;;  %v2558_v27 = vld [vmem:[%s3590_s30 + $0x38] sm:$0xff] }
 0xa19   :  { %v999_v30 = vmul.f32 %v2545_v23, %v991_v28  ;;  %2778 = vmatprep.mubr.msk.f32.mxu1 %vm60_vm0, %v3314_v29  ;;  %v2555_v23 = vld [vmem:[%s3590_s30 + $0x20] sm:$0xff]  ;;  %v2947_v28 = vpack.c.bf16 %v2558_v27, %v2557_v26 }
 0xa1b   :  { %v1007_v31 = vadd.f32 %v2546_v25, %v999_v30  ;;  %v2943_v25 = vpack.c.bf16 %v2556_v24, %v2555_v23 }
 0xa1d   :  { %2779 = vmatmul.mubr.msk.f32.vlgmr.msra.gmra.mrb[12].mxu1 %vm60_vm0, %v1007_v31  ;;  %2944 = vmatprep.subr.bf16.mxu1 %v2943_v25 }
 0xa1e   :  { %2946 = vmatpush3.bf16.msra.mxu1 %v2943_v25 }
 0xa1f   :  { %2948 = vmatprep.subr.bf16.mxu1 %v2947_v28 }
 0xa22   :  { %2950 = vmatpush3.bf16.msra.mxu1 %v2947_v28 }
 0xa23   :  { %2811 = vmatprep.subr.mxu1 %v3059_v36 }
 0xaf0   :  { %v2780_v48 = vpop.f32.mrb[12].mxu1 }
 0xaf1   :  { %v1097_v49 = vadd.f32 %v2780_v48, %v2547_v47  ;;  %v1091_v50 = vpop.f32.mrb[13].mxu1  ;;  %v2560_v48 = vld [vmem:[%s3571_s4 + $0x1] ss:$0 sm:$0xff] }
 0xaf2   :  { %v1092_v51 = vadd.f32 %v2547_v47, %v1091_v50 }
 0xaf3   :  { %v1103_v52 = vmul.f32 0.044715, %v1097_v49  ;;  %v1101_v3 = vmul.f32 0.5, %v1097_v49 }
 0xaf4   :  { %v1102_v53 = vmul.f32 0.044715, %v1092_v51  ;;  %v1100_v1 = vmul.f32 0.5, %v1092_v51 }
 0xaf5   :  { %v1105_v54 = vmul.f32 %v1103_v52, %v1097_v49 }
 0xaf6   :  { %v1104_v55 = vmul.f32 %v1102_v53, %v1092_v51 }
 0xaf7   :  { %v1107_v56 = vmul.f32 %v1105_v54, %v1097_v49 }
 0xaf8   :  { %v1106_v57 = vmul.f32 %v1104_v55, %v1092_v51 }
 0xaf9   :  { %v1109_v58 = vadd.f32 %v1107_v56, %v1097_v49 }
 0xafa   :  { %v1108_v59 = vadd.f32 %v1106_v57, %v1092_v51 }
 0xafb   :  { %v1111_v60 = vmul.f32 0.7978846, %v1109_v58 }
 0xafc   :  { %v1110_v61 = vmul.f32 0.7978846, %v1108_v59 }
 0xafd   :  { %3023 = vtanh.f32 %v1111_v60 }
 0xafe   :  { %3025 = vtanh.f32 %v1110_v61 }
 0xb07   :  { %v3024_v62 = vpop.eup %3023 }
 0xb08   :  { %v3026_v63 = vpop.eup %3025  ;;  %v1115_v0 = vadd.f32 1.0, %v3024_v62 }
 0xb09   :  { %v1114_v2 = vadd.f32 1.0, %v3026_v63 }
 0xb0a   :  { %v1117_v5 = vmul.f32 %v1115_v0, %v1101_v3 }
 0xb0b   :  { %v1116_v4 = vmul.f32 %v1114_v2, %v1100_v1 }
 0xb0d   :  { %2797 = vmatprep.mubr.msk.f32.mxu0 %vm1133_vm4, %v1116_v4 }
 0xb0e   :  { %2798 = vmatmul.mubr.msk.f32.vlgmr.msra.gmra.mrb[8].mxu0 %vm1133_vm4, %v1117_v5 }
 0xb0f   :  { %2823 = vmatprep.mubr.msk.f32.mxu0 %vm3060_vm1, %v3059_v36 }
 0xbe1   :  { %v2799_v7 = vpop.f32.mrb[8].mxu0 }
 0xbe2   :  { %v1212_v8 = vadd.f32 %v2799_v7, %v2550_v6  ;;  %v1206_v9 = vpop.f32.mrb[9].mxu0 }
 0xbe3   :  { %v1207_v10 = vadd.f32 %v2550_v6, %v1206_v9 }
 0xbe4   :  { %v1216_v35 = vadd.f32 %v1212_v8, %v1007_v31 }
 0xbe5   :  { %v1215_v33 = vadd.f32 %v1207_v10, %v3314_v29 }
 0xbe6   :  { %v1222_v11 = vsel %vm60_vm0, %v1216_v35, 0.0 }
 0xbe7   :  { %1223 = vadd.xlane.f32.xlu1 %v1222_v11  ;;  %v1219_v12 = vsel %vm60_vm0, %v1215_v33, 0.0 }
 0xbe8   :  { %1220 = vadd.xlane.f32.xlu0 %v1219_v12 }
 0xc74   :  { %v1224_v13 = vpop.xlane.xlu1 %1223 }
 0xc75   :  { %v1226_v14 = vmul.f32 0.03125, %v1224_v13  ;;  %v1221_v15 = vpop.xlane.xlu0 %1220 }
 0xc76   :  { %v1225_v16 = vmul.f32 0.03125, %v1221_v15 }
 0xc77   :  { %v1228_v17 = vsub.f32 %v1216_v35, %v1226_v14 }
 0xc78   :  { %v1227_v18 = vsub.f32 %v1215_v33, %v1225_v16 }
 0xc79   :  { %v1230_v19 = vmul.f32 %v1228_v17, %v1228_v17 }
 0xc7a   :  { %v1229_v20 = vmul.f32 %v1227_v18, %v1227_v18 }
 0xc7b   :  { %v1234_v21 = vsel %vm60_vm0, %v1230_v19, 0.0 }
 0xc7c   :  { %1235 = vadd.xlane.f32.xlu1 %v1234_v21  ;;  %v1231_v22 = vsel %vm60_vm0, %v1229_v20, 0.0 }
 0xc7d   :  { %1232 = vadd.xlane.f32.xlu0 %v1231_v22 }
 0xd09   :  { %v1236_v29 = vpop.xlane.xlu1 %1235 }
 0xd0a   :  { %v1238_v30 = vmul.f32 0.03125, %v1236_v29  ;;  %v1233_v31 = vpop.xlane.xlu0 %1232 }
 0xd0b   :  { %v1237_v32 = vmul.f32 0.03125, %v1233_v31 }
 0xd0c   :  { %v1240_v34 = vadd.f32 1e-12, %v1238_v30 }
 0xd0d   :  { %v1239_v37 = vadd.f32 1e-12, %v1237_v32 }
 0xd0e   :  { %3027 = vrsqrt.f32 %v1240_v34 }
 0xd0f   :  { %3029 = vrsqrt.f32 %v1239_v37 }
 0xd18   :  { %v3028_v38 = vpop.eup %3027 }
 0xd19   :  { %v3030_v40 = vpop.eup %3029  ;;  %v1244_v41 = vmul.f32 %v3028_v38, %v1228_v17 }
 0xd1a   :  { %v1243_v42 = vmul.f32 %v3030_v40, %v1227_v18 }
 0xd1b   :  { %v1252_v44 = vmul.f32 %v2553_v39, %v1244_v41 }
 0xd1c   :  { %v1251_v45 = vmul.f32 %v2553_v39, %v1243_v42 }
 0xd1d   :  { %v3380_v47 = vadd.f32 %v2554_v43, %v1252_v44 }
 0xd1e   :  { %v3378_v46 = vadd.f32 %v2554_v43, %v1251_v45 }
 0xd20   :  { %2808 = vmatprep.mubr.msk.f32.mxu1 %vm60_vm0, %v3378_v46 }
 0xd21   :  { %2809 = vmatmul.mubr.msk.f32.vlgmr.msra.gmra.mrb[14].mxu1 %vm60_vm0, %v3380_v47 }
 0xd22   :  { %2813 = vmatprep.mubr.msk.f32.mxu1 %vm3060_vm1, %v3059_v36 }
 0xdf4   :  { %v2810_v49 = vpop.f32.mrb[14].mxu1 }
 0xdf5   :  { %v1346_v50 = vpop.f32.mrb[15].mxu1  ;;  %v3397_v52 = vadd.f32 %v2810_v49, %v2560_v48 }
 0xdf6   :  { %v3391_v51 = vadd.f32 %v2560_v48, %v1346_v50  ;;  %v2575_v50 = vld [vmem:[%s3572_s5 + $0x20] sm:$0xff] }
 0xdf8   :  { %1522 = vrot.lane.b32.xlu1 %v3391_v51, %s3062_s28  ;;  %1356 = vrot.lane.b32.xlu0 %v3391_v51, %s3061_s27 }
 0xdfc   :  { %1520 = vrot.lane.b32.xlu1 %v3391_v51, %s3063_s29  ;;  %1858 = vrot.lane.b32.xlu0 %v3397_v52, %s3062_s28 }
 0xe00   :  { %1692 = vrot.lane.b32.xlu1 %v3397_v52, %s3061_s27 }
 0xe04   :  { %1856 = vrot.lane.b32.xlu1 %v3397_v52, %s3063_s29 }
 0xe6a   :  { %v1523_v53 = vpop.permute.xlu1 %1522  ;;  %v1357_v54 = vpop.permute.xlu0 %1356 }
 0xe6b   :  { %2812 = vmatpush3.xpose.msk.msra.mxu1 %vm199_vm2, %v1357_v54  ;;  %2822 = vmatpush3.xpose.msk.msra.mxu0 %vm199_vm2, %v1523_v53  ;;  %v2578_v53 = vld [vmem:[%s3572_s5 + $0x38] sm:$0xff] }
 0xe6c   :  { %2831 = vmatprep.subr.mxu0 %v3059_v36  ;;  %2816 = vmatprep.subr.mxu1 %v3059_v36 }
 0xe6e   :  { %v1521_v55 = vpop.permute.xlu1 %1520  ;;  %2814 = vmatmul.mubr.msk.f32.vlgmr.msra.gmra.mrb[16].mxu1 %vm199_vm2, %v3391_v51  ;;  %v1859_v57 = vpop.permute.xlu0 %1858 }
 0xe6f   :  { %2824 = vmatmul.mubr.msk.f32.vlgmr.msra.gmra.mrb[10].mxu0 %vm199_vm2, %v1521_v55  ;;  %2818 = vmatprep.mubr.msk.f32.mxu1 %vm3060_vm1, %v3059_v36 }
 0xe70   :  { %2833 = vmatprep.mubr.msk.f32.mxu0 %vm3060_vm1, %v3059_v36 }
 0xe72   :  { %v1693_v56 = vpop.permute.xlu1 %1692 }
 0xe73   :  { %2832 = vmatpush3.xpose.msk.msra.mxu0 %vm199_vm2, %v1693_v56 }
 0xe74   :  { %2841 = vmatprep.subr.mxu0 %v3059_v36 }
 0xe76   :  { %2834 = vmatmul.mubr.msk.f32.vlgmr.msra.gmra.mrb[12].mxu0 %vm199_vm2, %v3397_v52  ;;  %v1857_v58 = vpop.permute.xlu1 %1856 }
 0xe77   :  { %2842 = vmatpush3.xpose.msk.msra.mxu0 %vm199_vm2, %v1859_v57  ;;  %2843 = vmatprep.mubr.msk.f32.mxu0 %vm3060_vm1, %v3059_v36 }
 0xe7a   :  { %2844 = vmatmul.mubr.msk.f32.vlgmr.msra.gmra.mrb[14].mxu0 %vm199_vm2, %v1857_v58 }
 0xf41   :  { %v1428_v59 = vpop.f32.mrb[16].mxu1 }
 0xf42   :  { %v1432_v60 = vmul.f32 0.25, %v1428_v59  ;;  %v2815_v61 = vpop.f32.mrb[17].mxu1  ;;  %v1594_v62 = vpop.f32.mrb[10].mxu0 }
 0xf43   :  { %v1598_v63 = vmul.f32 0.25, %v1594_v62  ;;  %v2825_v0 = vpop.f32.mrb[11].mxu0 }
 0xf44   :  { %v1433_v1 = vsel %vm275_vm3, %v1432_v60, -inf }
 0xf45   :  { %1434 = vmax.xlane.f32.xlu0 %v1433_v1  ;;  %v1599_v2 = vsel %vm275_vm3, %v1598_v63, -inf }
 0xf46   :  { %1600 = vmax.xlane.f32.xlu1 %v1599_v2 }
 0xf49   :  { %v1764_v3 = vpop.f32.mrb[12].mxu0 }
 0xf4a   :  { %v1768_v4 = vmul.f32 0.25, %v1764_v3  ;;  %v2835_v5 = vpop.f32.mrb[13].mxu0  ;;  %v2580_v3 = vld [vmem:[%s3573_s6 + $0x1] ss:$0 sm:$0xff] }
 0xf4c   :  { %v1769_v6 = vsel %vm275_vm3, %v1768_v4, -inf }
 0xf4d   :  { %1770 = vmax.xlane.f32.xlu0 %v1769_v6  ;;  %v1930_v7 = vpop.f32.mrb[14].mxu0 }
 0xf4e   :  { %v1934_v8 = vmul.f32 0.25, %v1930_v7  ;;  %v2845_v9 = vpop.f32.mrb[15].mxu0 }
 0xf50   :  { %v1935_v10 = vsel %vm275_vm3, %v1934_v8, -inf }
 0xf51   :  { %1936 = vmax.xlane.f32.xlu0 %v1935_v10 }
 0xfd2   :  { %v1435_v35 = vpop.xlane.xlu0 %1434 }
 0xfd3   :  { %v1436_v33 = vsub.f32 %v1432_v60, %v1435_v35  ;;  %v1601_v11 = vpop.xlane.xlu1 %1600 }
 0xfd4   :  { %v1602_v12 = vsub.f32 %v1598_v63, %v1601_v11 }
 0xfd5   :  { %v1437_v13 = vmul.f32 1.442695, %v1436_v33 }
 0xfd6   :  { %v1603_v14 = vmul.f32 1.442695, %v1602_v12 }
 0xfd7   :  { %3031 = vpow2.f32 %v1437_v13 }
 0xfd8   :  { %3033 = vpow2.f32 %v1603_v14 }
 0xfda   :  { %v1771_v15 = vpop.xlane.xlu0 %1770 }
 0xfdb   :  { %v1772_v16 = vsub.f32 %v1768_v4, %v1771_v15 }
 0xfdd   :  { %v1773_v17 = vmul.f32 1.442695, %v1772_v16 }
 0xfde   :  { %v1937_v24 = vpop.xlane.xlu0 %1936 }
 0xfdf   :  { %3035 = vpow2.f32 %v1773_v17  ;;  %v1938_v25 = vsub.f32 %v1934_v8, %v1937_v24 }
 0xfe1   :  { %v3032_v18 = vpop.eup %3031  ;;  %v1939_v26 = vmul.f32 1.442695, %v1938_v25 }
 0xfe2   :  { %v3034_v19 = vpop.eup %3033  ;;  %v1439_v20 = vsel %vm275_vm3, %v3032_v18, 0.0 }
 0xfe3   :  { %1440 = vadd.xlane.f32.xlu0 %v1439_v20  ;;  %v1605_v21 = vsel %vm275_vm3, %v3034_v19, 0.0  ;;  %3037 = vpow2.f32 %v1939_v26 }
 0xfe4   :  { %1606 = vadd.xlane.f32.xlu1 %v1605_v21  ;;  %v2589_v21 = vld [vmem:[%s3574_s9 + $0x30] sm:$0xff] }
 0xfe9   :  { %v3036_v22 = vpop.eup %3035 }
 0xfea   :  { %v1775_v23 = vsel %vm275_vm3, %v3036_v22, 0.0 }
 0xfeb   :  { %1776 = vadd.xlane.f32.xlu0 %v1775_v23 }
 0xfed   :  { %v3038_v27 = vpop.eup %3037 }
 0xfee   :  { %v1941_v28 = vsel %vm275_vm3, %v3038_v27, 0.0 }
 0xff5   :  { %1610 = vrot.lane.b32.xlu1 %v3391_v51, %s3065_s18 }
 0xff9   :  { %1780 = vrot.lane.b32.xlu1 %v3397_v52, %s3064_s0 }
0x1001   :  { %1444 = vrot.lane.b32.xlu0 %v3391_v51, %s3064_s0  ;;  %v2576_v51 = vld [vmem:[%s3572_s5 + $0x28] sm:$0xff] }
0x101d   :  { %1942 = vadd.xlane.f32.xlu1 %v1941_v28 }
0x102e   :  { %1946 = vrot.lane.b32.xlu1 %v3397_v52, %s3065_s18  ;;  %v2951_v52 = vpack.c.bf16 %v2576_v51, %v2575_v50  ;;  %v2599_v51 = vld [vmem:[%s3577_s11 + $0x60] sm:$0xff] }
0x1030   :  { %2952 = vmatprep.subr.bf16.mxu0 %v2951_v52 }
0x1031   :  { %2954 = vmatpush3.bf16.msra.mxu0 %v2951_v52 }
0x1070   :  { %v1441_v29 = vpop.xlane.xlu0 %1440 }
0x1071   :  { %3039 = vrcp.f32 %v1441_v29  ;;  %v1607_v30 = vpop.xlane.xlu1 %1606 }
0x1072   :  { %3041 = vrcp.f32 %v1607_v30 }
0x1075   :  { %v1611_v37 = vpop.permute.xlu1 %1610 }
0x1078   :  { %v1777_v31 = vpop.xlane.xlu0 %1776 }
0x1079   :  { %3043 = vrcp.f32 %v1777_v31  ;;  %v1781_v41 = vpop.permute.xlu1 %1780  ;;  %v2585_v31 = vld [vmem:[%s3575_s7 + $0x1] ss:$0 sm:$0xff] }
0x107b   :  { %v3040_v32 = vpop.eup %3039 }
0x107c   :  { %v1443_v34 = vmul.f32 %v3040_v32, %v3032_v18  ;;  %v1445_v38 = vpop.permute.xlu0 %1444  ;;  %v3042_v39 = vpop.eup %3041 }
0x107d   :  { %2817 = vmatpush3.msra.mxu1 %v1445_v38  ;;  %v1609_v40 = vmul.f32 %v3042_v39, %v3034_v19  ;;  %v2588_v19 = vld [vmem:[%s3574_s9 + $0x28] sm:$0xff] }
0x107e   :  { %2819 = vmatmul.mubr.msk.f32.vlgmr.msra.gmra.mrb[18].mxu1 %vm275_vm3, %v1443_v34  ;;  %2826 = vmatprep.subr.mxu1 %v3059_v36  ;;  %v2586_v34 = vld [vmem:[%s3576_s8 + $0x1] ss:$0 sm:$0xff] }
0x107f   :  { %2827 = vmatpush3.msra.mxu1 %v1611_v37  ;;  %2828 = vmatprep.mubr.msk.f32.mxu1 %vm3060_vm1, %v3059_v36 }
0x1080   :  { %2836 = vmatprep.subr.mxu1 %v3059_v36 }
0x1082   :  { %2829 = vmatmul.mubr.msk.f32.vlgmr.msra.gmra.mrb[20].mxu1 %vm275_vm3, %v1609_v40 }
0x1083   :  { %v3044_v42 = vpop.eup %3043  ;;  %2837 = vmatpush3.msra.mxu1 %v1781_v41  ;;  %2838 = vmatprep.mubr.msk.f32.mxu1 %vm3060_vm1, %v3059_v36 }
0x1084   :  { %v1779_v43 = vmul.f32 %v3044_v42, %v3036_v22  ;;  %2846 = vmatprep.subr.mxu1 %v3059_v36  ;;  %v2590_v22 = vld [vmem:[%s3574_s9 + $0x38] sm:$0xff] }
0x1085   :  { %v2963_v23 = vpack.c.bf16 %v2590_v22, %v2589_v21 }
0x1086   :  { %2839 = vmatmul.mubr.msk.f32.vlgmr.msra.gmra.mrb[22].mxu1 %vm275_vm3, %v1779_v43  ;;  %v2595_v43 = vld [vmem:[%s3577_s11 + $0x40] sm:$0xff] }
0x1087   :  { %2848 = vmatprep.mubr.msk.f32.mxu1 %vm3060_vm1, %v3059_v36  ;;  %v2577_v36 = vld [vmem:[%s3572_s5 + $0x30] sm:$0xff] }
0x1088   :  { %v2955_v54 = vpack.c.bf16 %v2578_v53, %v2577_v36  ;;  %v2600_v36 = vld [vmem:[%s3577_s11 + $0x68] sm:$0xff]  ;;  %v2601_v53 = vld [vmem:[%s3577_s11 + $0x70] sm:$0xff] }
0x1089   :  { %v2975_v52 = vpack.c.bf16 %v2600_v36, %v2599_v51  ;;  %v2610_v36 = vld [vmem:[%s3581_s14 + $0x1] ss:$0 sm:$0xff] }
0x108a   :  { %2956 = vmatprep.subr.bf16.mxu0 %v2955_v54 }
0x108b   :  { %2958 = vmatpush3.bf16.msra.mxu0 %v2955_v54  ;;  %v2602_v54 = vld [vmem:[%s3577_s11 + $0x78] sm:$0xff] }
0x10aa   :  { %v1943_v44 = vpop.xlane.xlu1 %1942 }
0x10ab   :  { %3045 = vrcp.f32 %v1943_v44  ;;  %v2596_v44 = vld [vmem:[%s3577_s11 + $0x48] sm:$0xff] }
0x10ae   :  { %v1947_v45 = vpop.permute.xlu1 %1946 }
0x10af   :  { %2847 = vmatpush3.msra.mxu1 %v1947_v45  ;;  %v2967_v45 = vpack.c.bf16 %v2596_v44, %v2595_v43 }
0x10b1   :  { %2968 = vmatprep.subr.bf16.mxu0 %v2967_v45 }
0x10b5   :  { %v3046_v48 = vpop.eup %3045 }
0x10b6   :  { %v1945_v49 = vmul.f32 %v3046_v48, %v3038_v27  ;;  %v2597_v48 = vld [vmem:[%s3577_s11 + $0x50] sm:$0xff] }
0x10b8   :  { %2849 = vmatmul.mubr.msk.f32.vlgmr.msra.gmra.mrb[24].mxu1 %vm275_vm3, %v1945_v49  ;;  %v2598_v49 = vld [vmem:[%s3577_s11 + $0x58] sm:$0xff] }
0x10b9   :  { %v2971_v50 = vpack.c.bf16 %v2598_v49, %v2597_v48  ;;  %v2609_v48 = vld [vmem:[%s3580_s13 + $0x1] ss:$0 sm:$0xff] }
0x1151   :  { %v1516_v55 = vpop.f32.mrb[18].mxu1 }
0x1152   :  { %v2820_v56 = vpop.f32.mrb[19].mxu1 }
0x1153   :  { %v2592_v56 = vld [vmem:[%s3578_s10 + $0x1] ss:$0 sm:$0xff] }
0x1155   :  { %v1682_v57 = vpop.f32.mrb[20].mxu1 }
0x1156   :  { %1687 = vrot.lane.b32.xlu0 %v1682_v57, %s3066_s26  ;;  %v2830_v58 = vpop.f32.mrb[21].mxu1 }
0x1159   :  { %v1852_v59 = vpop.f32.mrb[22].mxu1 }
0x115a   :  { %v2840_v60 = vpop.f32.mrb[23].mxu1 }
0x118b   :  { %v2018_v61 = vpop.f32.mrb[24].mxu1 }
0x118c   :  { %2023 = vrot.lane.b32.xlu1 %v2018_v61, %s3066_s26  ;;  %v2850_v62 = vpop.f32.mrb[25].mxu1 }
0x11c8   :  { %v1688_v63 = vpop.permute.xlu0 %1687 }
0x11c9   :  { %v1690_v0 = vsel %vm199_vm2, %v1516_v55, %v1688_v63  ;;  %v2979_v55 = vpack.c.bf16 %v2602_v54, %v2601_v53 }
0x11ca   :  { %2859 = vmatprep.mubr.msk.f32.mxu0 %vm60_vm0, %v1690_v0 }
0x11fe   :  { %v2024_v1 = vpop.permute.xlu1 %2023 }
0x11ff   :  { %v2026_v2 = vsel %vm199_vm2, %v1852_v59, %v2024_v1 }
0x1200   :  { %2860 = vmatmul.mubr.msk.f32.vlgmr.msra.gmra.mrb[16].mxu0 %vm60_vm0, %v2026_v2 }
0x1201   :  { %2970 = vmatpush3.bf16.msra.mxu0 %v2967_v45 }
0x1202   :  { %2972 = vmatprep.subr.bf16.mxu0 %v2971_v50 }
0x1205   :  { %2974 = vmatpush3.bf16.msra.mxu0 %v2971_v50 }
0x1206   :  { %2976 = vmatprep.subr.bf16.mxu0 %v2975_v52 }
0x1209   :  { %2978 = vmatpush3.bf16.msra.mxu0 %v2975_v52 }
0x120a   :  { %2980 = vmatprep.subr.bf16.mxu0 %v2979_v55 }
0x120d   :  { %2982 = vmatpush3.bf16.msra.mxu0 %v2979_v55 }
0x12d3   :  { %v2861_v4 = vpop.f32.mrb[16].mxu0 }
0x12d4   :  { %v2118_v5 = vadd.f32 %v2861_v4, %v2580_v3  ;;  %v2112_v6 = vpop.f32.mrb[17].mxu0 }
0x12d5   :  { %v2113_v7 = vadd.f32 %v2580_v3, %v2112_v6 }
0x12d6   :  { %v2122_v8 = vadd.f32 %v2118_v5, %v3380_v47 }
0x12d7   :  { %v2121_v9 = vadd.f32 %v2113_v7, %v3378_v46  ;;  %v2587_v46 = vld [vmem:[%s3574_s9 + $0x20] sm:$0xff] }
0x12d8   :  { %v2130_v10 = vsel %vm60_vm0, %v2122_v8, 0.0  ;;  %v2959_v20 = vpack.c.bf16 %v2588_v19, %v2587_v46 }
0x12d9   :  { %2131 = vadd.xlane.f32.xlu1 %v2130_v10  ;;  %v2127_v35 = vsel %vm60_vm0, %v2121_v9, 0.0 }
0x12da   :  { %2128 = vadd.xlane.f32.xlu0 %v2127_v35  ;;  %2960 = vmatprep.subr.bf16.mxu1 %v2959_v20 }
0x12db   :  { %2962 = vmatpush3.bf16.msra.mxu1 %v2959_v20 }
0x12dc   :  { %2964 = vmatprep.subr.bf16.mxu1 %v2963_v23 }
0x12df   :  { %2966 = vmatpush3.bf16.msra.mxu1 %v2963_v23 }
0x1366   :  { %v2132_v33 = vpop.xlane.xlu1 %2131 }
0x1367   :  { %v2134_v11 = vmul.f32 0.03125, %v2132_v33  ;;  %v2129_v12 = vpop.xlane.xlu0 %2128 }
0x1368   :  { %v2133_v13 = vmul.f32 0.03125, %v2129_v12 }
0x1369   :  { %v2136_v14 = vsub.f32 %v2122_v8, %v2134_v11 }
0x136a   :  { %v2135_v15 = vsub.f32 %v2121_v9, %v2133_v13  ;;  %v2604_v13 = vld [vmem:[%s3579_s12 + $0x1] ss:$0 sm:$0xff] }
0x136b   :  { %v2138_v18 = vmul.f32 %v2136_v14, %v2136_v14 }
0x136c   :  { %v2137_v16 = vmul.f32 %v2135_v15, %v2135_v15 }
0x136d   :  { %v2142_v47 = vsel %vm60_vm0, %v2138_v18, 0.0 }
0x136e   :  { %v2139_v17 = vsel %vm60_vm0, %v2137_v16, 0.0 }
0x136f   :  { %2140 = vadd.xlane.f32.xlu0 %v2139_v17 }
0x1373   :  { %2143 = vadd.xlane.f32.xlu0 %v2142_v47 }
0x13fc   :  { %v2141_v24 = vpop.xlane.xlu0 %2140 }
0x13fd   :  { %v2145_v25 = vmul.f32 0.03125, %v2141_v24 }
0x13ff   :  { %v2147_v26 = vadd.f32 1e-12, %v2145_v25 }
0x1400   :  { %v2144_v27 = vpop.xlane.xlu0 %2143 }
0x1401   :  { %3047 = vrsqrt.f32 %v2147_v26  ;;  %v2146_v28 = vmul.f32 0.03125, %v2144_v27 }
0x1403   :  { %v2148_v29 = vadd.f32 1e-12, %v2146_v28 }
0x1405   :  { %3049 = vrsqrt.f32 %v2148_v29 }
0x140b   :  { %v3048_v30 = vpop.eup %3047 }
0x140c   :  { %v2151_v32 = vmul.f32 %v3048_v30, %v2135_v15  ;;  %v2427_v30 = vld [vmem:[%s3582_s15] sm:$0xff] }
0x140e   :  { %v2159_v37 = vmul.f32 %v2585_v31, %v2151_v32 }
0x140f   :  { %v3050_v38 = vpop.eup %3049 }
0x1410   :  { %v2152_v39 = vmul.f32 %v3050_v38, %v2136_v14  ;;  %v2167_v40 = vadd.f32 %v2586_v34, %v2159_v37  ;;  %v2430_v37 = vld [vmem:[%s3582_s15 + $0x18] sm:$0xff] }
0x1412   :  { %v2160_v41 = vmul.f32 %v2585_v31, %v2152_v39  ;;  %2870 = vmatprep.mubr.msk.f32.mxu1 %vm60_vm0, %v2167_v40  ;;  %v2428_v31 = vld [vmem:[%s3582_s15 + $0x8] sm:$0xff] }
0x1413   :  { %v2983_v32 = vpack.c.bf16 %v2428_v31, %v2427_v30 }
0x1414   :  { %v2168_v42 = vadd.f32 %v2586_v34, %v2160_v41  ;;  %v2429_v34 = vld [vmem:[%s3582_s15 + $0x10] sm:$0xff] }
0x1415   :  { %2984 = vmatprep.subr.bf16.mxu1 %v2983_v32  ;;  %v2987_v38 = vpack.c.bf16 %v2430_v37, %v2429_v34 }
0x1416   :  { %2871 = vmatmul.mubr.msk.f32.vlgmr.msra.gmra.mrb[26].mxu1 %vm60_vm0, %v2168_v42 }
0x1417   :  { %2986 = vmatpush3.bf16.msra.mxu1 %v2983_v32 }
0x1418   :  { %2988 = vmatprep.subr.bf16.mxu1 %v2987_v38 }
0x141b   :  { %2990 = vmatpush3.bf16.msra.mxu1 %v2987_v38 }
0x14e9   :  { %v2872_v57 = vpop.f32.mrb[26].mxu1 }
0x14ea   :  { %v2260_v58 = vadd.f32 %v2872_v57, %v2592_v56  ;;  %v2254_v59 = vpop.f32.mrb[27].mxu1 }
0x14eb   :  { %v2255_v60 = vadd.f32 %v2592_v56, %v2254_v59  ;;  %v2611_v56 = vld [vmem:[%s3583_s16] ss:$0 sm:$0xff] }
0x14ec   :  { %v2266_v61 = vmul.f32 0.044715, %v2260_v58  ;;  %v2264_v33 = vmul.f32 0.5, %v2260_v58 }
0x14ed   :  { %v2265_v62 = vmul.f32 0.044715, %v2255_v60  ;;  %v2263_v10 = vmul.f32 0.5, %v2255_v60 }
0x14ee   :  { %v2268_v63 = vmul.f32 %v2266_v61, %v2260_v58 }
0x14ef   :  { %v2267_v0 = vmul.f32 %v2265_v62, %v2255_v60 }
0x14f0   :  { %v2270_v1 = vmul.f32 %v2268_v63, %v2260_v58 }
0x14f1   :  { %v2269_v2 = vmul.f32 %v2267_v0, %v2255_v60 }
0x14f2   :  { %v2272_v3 = vadd.f32 %v2270_v1, %v2260_v58 }
0x14f3   :  { %v2271_v4 = vadd.f32 %v2269_v2, %v2255_v60 }
0x14f4   :  { %v2274_v5 = vmul.f32 0.7978846, %v2272_v3 }
0x14f5   :  { %v2273_v6 = vmul.f32 0.7978846, %v2271_v4 }
0x14f6   :  { %3051 = vtanh.f32 %v2274_v5 }
0x14f7   :  { %3053 = vtanh.f32 %v2273_v6 }
0x1500   :  { %v3052_v7 = vpop.eup %3051 }
0x1501   :  { %v3054_v8 = vpop.eup %3053  ;;  %v2278_v9 = vadd.f32 1.0, %v3052_v7 }
0x1502   :  { %v2277_v35 = vadd.f32 1.0, %v3054_v8 }
0x1503   :  { %v2280_v12 = vmul.f32 %v2278_v9, %v2264_v33 }
0x1504   :  { %v2279_v11 = vmul.f32 %v2277_v35, %v2263_v10 }
0x1506   :  { %2889 = vmatprep.mubr.msk.f32.mxu0 %vm1133_vm4, %v2279_v11 }
0x1507   :  { %2890 = vmatmul.mubr.msk.f32.vlgmr.msra.gmra.mrb[18].mxu0 %vm1133_vm4, %v2280_v12 }
0x15da   :  { %v2891_v14 = vpop.f32.mrb[18].mxu0 }
0x15db   :  { %v2376_v15 = vadd.f32 %v2891_v14, %v2604_v13  ;;  %v2370_v16 = vpop.f32.mrb[19].mxu0 }
0x15dc   :  { %v2371_v17 = vadd.f32 %v2604_v13, %v2370_v16 }
0x15dd   :  { %v2380_v18 = vadd.f32 %v2376_v15, %v2168_v42 }
0x15de   :  { %v2379_v47 = vadd.f32 %v2371_v17, %v2167_v40 }
0x15df   :  { %v2388_v46 = vsel %vm60_vm0, %v2380_v18, 0.0 }
0x15e0   :  { %2389 = vadd.xlane.f32.xlu1 %v2388_v46  ;;  %v2385_v19 = vsel %vm60_vm0, %v2379_v47, 0.0 }
0x15e1   :  { %2386 = vadd.xlane.f32.xlu0 %v2385_v19 }
0x166d   :  { %v2390_v20 = vpop.xlane.xlu1 %2389 }
0x166e   :  { %v2392_v21 = vmul.f32 0.03125, %v2390_v20  ;;  %v2387_v22 = vpop.xlane.xlu0 %2386 }
0x166f   :  { %v2391_v23 = vmul.f32 0.03125, %v2387_v22 }
0x1670   :  { %v2394_v24 = vsub.f32 %v2380_v18, %v2392_v21 }
0x1671   :  { %v2393_v25 = vsub.f32 %v2379_v47, %v2391_v23 }
0x1672   :  { %v2396_v26 = vmul.f32 %v2394_v24, %v2394_v24 }
0x1673   :  { %v2395_v27 = vmul.f32 %v2393_v25, %v2393_v25 }
0x1674   :  { %v2400_v28 = vsel %vm60_vm0, %v2396_v26, 0.0 }
0x1675   :  { %2401 = vadd.xlane.f32.xlu1 %v2400_v28  ;;  %v2397_v29 = vsel %vm60_vm0, %v2395_v27, 0.0 }
0x1676   :  { %2398 = vadd.xlane.f32.xlu0 %v2397_v29 }
0x1702   :  { %v2402_v39 = vpop.xlane.xlu1 %2401 }
0x1703   :  { %v2404_v40 = vmul.f32 0.03125, %v2402_v39  ;;  %v2399_v41 = vpop.xlane.xlu0 %2398 }
0x1704   :  { %v2403_v42 = vmul.f32 0.03125, %v2399_v41 }
0x1705   :  { %v2406_v43 = vadd.f32 1e-12, %v2404_v40 }
0x1706   :  { %v2405_v44 = vadd.f32 1e-12, %v2403_v42 }
0x1707   :  { %3055 = vrsqrt.f32 %v2406_v43 }
0x1708   :  { %3057 = vrsqrt.f32 %v2405_v44 }
0x1711   :  { %v3056_v45 = vpop.eup %3055 }
0x1712   :  { %v3058_v49 = vpop.eup %3057  ;;  %v2410_v50 = vmul.f32 %v3056_v45, %v2394_v24 }
0x1713   :  { %v2409_v51 = vmul.f32 %v3058_v49, %v2393_v25 }
0x1714   :  { %v2418_v52 = vmul.f32 %v2609_v48, %v2410_v50 }
0x1715   :  { %v2417_v53 = vmul.f32 %v2609_v48, %v2409_v51 }
0x1716   :  { %v2426_v55 = vadd.f32 %v2610_v36, %v2418_v52 }
0x1717   :  { %v2425_v54 = vadd.f32 %v2610_v36, %v2417_v53 }
0x1719   :  { %2900 = vmatprep.mubr.msk.f32.mxu1 %vm60_vm0, %v2425_v54 }
0x171a   :  { %2901 = vmatmul.mubr.msk.f32.vlgmr.msra.gmra.mrb[28].mxu1 %vm60_vm0, %v2426_v55 }
0x17ed   :  { %v2902_v57 = vpop.f32.mrb[28].mxu1 }
0x17ee   :  { %v2516_v58 = vadd.f32 %v2902_v57, %v2611_v56  ;;  %v2510_v59 = vpop.f32.mrb[29].mxu1 }
0x17ef   :  { %v2511_v60 = vadd.f32 %v2611_v56, %v2510_v59 }
0x17f0   :  { %2520 = vst [vmem:[%s3584_s17 + $0x8] sm:$0xff] %v2516_v58 }
0x17f1   :  { %2519 = vst [vmem:[%s3584_s17] sm:$0xff] %v2511_v60 }

</bundles_post_ra>
